<compile_context>
chip_gen: v5e
topology: v5e:2x2
jax: 0.10.0
libtpu: 0.0.40
codegen_flags: <defaults>
</compile_context>

<pallas_src>
import jax
import jax.numpy as jnp
from jax.experimental import pallas as pl
from jax.experimental.pallas import tpu as pltpu

D = 640  # final_feat_dim fixed by the module


def _pair_linear_kernel(x1_ref, x2_ref, wt_ref, b_ref, o1_ref, o2_ref):
    # x1_ref/x2_ref : (TM, Din)   row tiles of the two inputs
    # wt_ref        : (Din, Dout) pre-transposed weight, VMEM-resident
    # b_ref         : (1, Dout)   bias row
    # o1_ref/o2_ref : (TM, Dout)  lane-dense (640 = 5*128) output tiles
    tm = x1_ref.shape[0]
    x = jnp.concatenate([x1_ref[...], x2_ref[...]], axis=0)       # (2*TM, Din)
    y = jnp.dot(x, wt_ref[...], preferred_element_type=jnp.float32)
    y = y + b_ref[...]
    o1_ref[...] = y[:tm].astype(o1_ref.dtype)
    o2_ref[...] = y[tm:].astype(o2_ref.dtype)


def overall_model_som_forward(x1, x2, w, b, *, tile_m=256):
    """Replicates overall_model_som.forward: apply train_w to both inputs."""
    B, Din = x1.shape
    Dout = w.shape[0]
    assert Din == D and Dout == D and x2.shape == (B, Din)

    # One-time parameter prep (static params; amortized across calls).
    wt = w.T                      # (Din, Dout): clean (K, N) RHS for the MXU
    b2 = b.reshape(1, Dout)       # 2-D row for TPU layout

    # Row tiling: single block for small batches, 256-row tiles otherwise.
    tm = B if B <= tile_m else tile_m
    grid = (pl.cdiv(B, tm),)

    flops = 2 * (2 * B) * Din * Dout
    bytes_accessed = 4 * (2 * B * Din + 2 * B * Dout + Din * Dout + Dout)

    out1, out2 = pl.pallas_call(
        _pair_linear_kernel,
        out_shape=(
            jax.ShapeDtypeStruct((B, Dout), jnp.float32),
            jax.ShapeDtypeStruct((B, Dout), jnp.float32),
        ),
        grid=grid,
        in_specs=[
            pl.BlockSpec((tm, Din), lambda i: (i, 0)),     # x1 row tile
            pl.BlockSpec((tm, Din), lambda i: (i, 0)),     # x2 row tile
            pl.BlockSpec((Din, Dout), lambda i: (0, 0)),   # weight: resident
            pl.BlockSpec((1, Dout), lambda i: (0, 0)),     # bias: resident
        ],
        out_specs=(
            pl.BlockSpec((tm, Dout), lambda i: (i, 0)),
            pl.BlockSpec((tm, Dout), lambda i: (i, 0)),
        ),
        compiler_params=pltpu.CompilerParams(
            dimension_semantics=("parallel",),
            vmem_limit_bytes=32 * 1024 * 1024,
        ),
        cost_estimate=pl.CostEstimate(
            flops=flops, transcendentals=0, bytes_accessed=bytes_accessed),
    )(x1, x2, wt, b2)

    return out1, out2


if __name__ == "__main__":
    key = jax.random.PRNGKey(0)
    k1, k2, kb = jax.random.split(key, 3)

    B = 8  # small batch; feature dim 640 is fixed by the module
    x1 = jax.random.normal(k1, (B, D), dtype=jnp.float32)
    x2 = jax.random.normal(k2, (B, D), dtype=jnp.float32)

    # Parameters of train_w (nn.Linear(640, 640)):
    #   weight.data := eye(640)  (as set in the module's __init__)
    #   bias        := deterministic uniform(-1/sqrt(D), 1/sqrt(D)) init
    w = jnp.eye(D, dtype=jnp.float32)
    bound = 1.0 / (D ** 0.5)
    b = jax.random.uniform(kb, (D,), minval=-bound, maxval=bound,
                           dtype=jnp.float32)

    f1, f2 = overall_model_som_forward(x1, x2, w, b)
    f1 = jax.block_until_ready(f1)
    f2 = jax.block_until_ready(f2)

    # Reference check against plain-JAX linear (nn.Linear semantics: x @ W^T + b).
    ref1 = x1 @ w.T + b
    ref2 = x2 @ w.T + b
    assert jnp.allclose(f1, ref1, atol=1e-5, rtol=1e-5)
    assert jnp.allclose(f2, ref2, atol=1e-5, rtol=1e-5)

    print("KERNEL_OK")
</pallas_src>

<mosaic_0001>
module attributes {stable_mosaic.version = 11 : i64} {
  func.func @_pair_linear_kernel(%arg0: i32, %arg1: memref<8x640xf32, #tpu.memory_space<vmem>>, %arg2: memref<8x640xf32, #tpu.memory_space<vmem>>, %arg3: memref<640x640xf32, #tpu.memory_space<vmem>>, %arg4: memref<1x640xf32, #tpu.memory_space<vmem>>, %arg5: memref<8x640xf32, #tpu.memory_space<vmem>>, %arg6: memref<8x640xf32, #tpu.memory_space<vmem>>) attributes {dimension_semantics = [#tpu.dimension_semantics<parallel>], iteration_bounds = array<i64: 1>, scalar_prefetch = 0 : i64, scratch_operands = 0 : i64, tpu.core_type = #tpu.core_type<tc>, window_params = [{transform_indices = @transform_0, window_bounds = array<i64: 8, 640>}, {transform_indices = @transform_1, window_bounds = array<i64: 8, 640>}, {pipeline_mode = #tpu.pipeline_mode<synchronous>, transform_indices = @transform_2, window_bounds = array<i64: 640, 640>}, {pipeline_mode = #tpu.pipeline_mode<synchronous>, transform_indices = @transform_3, window_bounds = array<i64: 1, 640>}, {transform_indices = @transform_4, window_bounds = array<i64: 8, 640>}, {transform_indices = @transform_5, window_bounds = array<i64: 8, 640>}]} {
    %c0 = arith.constant 0 : index
    %c0_0 = arith.constant 0 : index
    %0 = vector.load %arg1[%c0, %c0_0] : memref<8x640xf32, #tpu.memory_space<vmem>>, vector<8x640xf32>
    %c0_1 = arith.constant 0 : index
    %c0_2 = arith.constant 0 : index
    %1 = vector.load %arg2[%c0_1, %c0_2] : memref<8x640xf32, #tpu.memory_space<vmem>>, vector<8x640xf32>
    %2 = tpu.concatenate %0, %1 in 0 : vector<8x640xf32>, vector<8x640xf32> -> vector<16x640xf32>
    %c0_3 = arith.constant 0 : index
    %c0_4 = arith.constant 0 : index
    %3 = vector.load %arg3[%c0_3, %c0_4] : memref<640x640xf32, #tpu.memory_space<vmem>>, vector<640x640xf32>
    %cst = arith.constant dense<0.000000e+00> : vector<16x640xf32>
    %4 = tpu.matmul %2, %3, %cst {dimension_numbers = #tpu.dot_dimension_numbers<[1], [0], [0], [1], [0, 0, 1, 1], [], []>} : vector<16x640xf32>, vector<640x640xf32>, vector<16x640xf32> -> vector<16x640xf32>
    %c0_5 = arith.constant 0 : index
    %c0_6 = arith.constant 0 : index
    %5 = vector.load %arg4[%c0_5, %c0_6] : memref<1x640xf32, #tpu.memory_space<vmem>>, vector<1x640xf32>
    %6 = vector.broadcast %5 : vector<1x640xf32> to vector<16x640xf32>
    %7 = arith.addf %4, %6 : vector<16x640xf32>
    %8 = vector.extract_strided_slice %7 {offsets = [0, 0], sizes = [8, 640], strides = [1, 1]} : vector<16x640xf32> to vector<8x640xf32>
    %c0_7 = arith.constant 0 : index
    %c0_8 = arith.constant 0 : index
    %9 = vector.load %arg5[%c0_7, %c0_8] : memref<8x640xf32, #tpu.memory_space<vmem>>, vector<8x640xf32>
    tpu.vector_store %arg5[%c0_7, %c0_8], %8 {strides = array<i32>} : memref<8x640xf32, #tpu.memory_space<vmem>>, vector<8x640xf32>,
    %10 = vector.extract_strided_slice %7 {offsets = [8, 0], sizes = [8, 640], strides = [1, 1]} : vector<16x640xf32> to vector<8x640xf32>
    %c0_9 = arith.constant 0 : index
    %c0_10 = arith.constant 0 : index
    %11 = vector.load %arg6[%c0_9, %c0_10] : memref<8x640xf32, #tpu.memory_space<vmem>>, vector<8x640xf32>
    tpu.vector_store %arg6[%c0_9, %c0_10], %10 {strides = array<i32>} : memref<8x640xf32, #tpu.memory_space<vmem>>, vector<8x640xf32>,
    return
  }
  func.func @transform_0(%arg0: i32) -> (i32, i32) {
    %c0_i32 = arith.constant 0 : i32
    %c0_i32_0 = arith.constant 0 : i32
    return %arg0, %c0_i32 : i32, i32
  }
  func.func @transform_1(%arg0: i32) -> (i32, i32) {
    %c0_i32 = arith.constant 0 : i32
    %c0_i32_0 = arith.constant 0 : i32
    return %arg0, %c0_i32 : i32, i32
  }
  func.func @transform_2(%arg0: i32) -> (i32, i32) {
    %c0_i32 = arith.constant 0 : i32
    %c0_i32_0 = arith.constant 0 : i32
    %c0_i32_1 = arith.constant 0 : i32
    return %c0_i32, %c0_i32_0 : i32, i32
  }
  func.func @transform_3(%arg0: i32) -> (i32, i32) {
    %c0_i32 = arith.constant 0 : i32
    %c0_i32_0 = arith.constant 0 : i32
    %c0_i32_1 = arith.constant 0 : i32
    return %c0_i32, %c0_i32_0 : i32, i32
  }
  func.func @transform_4(%arg0: i32) -> (i32, i32) {
    %c0_i32 = arith.constant 0 : i32
    %c0_i32_0 = arith.constant 0 : i32
    return %arg0, %c0_i32 : i32, i32
  }
  func.func @transform_5(%arg0: i32) -> (i32, i32) {
    %c0_i32 = arith.constant 0 : i32
    %c0_i32_0 = arith.constant 0 : i32
    return %arg0, %c0_i32 : i32, i32
  }
}

</mosaic_0001>

<bundles_post_ra>
// kernel: tpu_custom_call.1
= control target key start
LH: loop header
LB: loop body
LE: loop exit
PB: predicated region body
PF: predicated region fallthrough
CT: control target
= control target key end

     0   :  { %11 = vsyncpa [#allocation3], 0  ;;  %s1451_s0 = inlined_call_operand.hbm [shape: f32[8,640], index: 0, kind: input, shape index: {}]   ;;  %s1452_s1 = inlined_call_operand.hbm [shape: f32[8,640], index: 1, kind: input, shape index: {}]   ;;  %s1453_s2 = inlined_call_operand.hbm [shape: f32[640,640], index: 2, kind: input, shape index: {}]   ;;  %s1454_s3 = inlined_call_operand.hbm [shape: f32[1,640], index: 3, kind: input, shape index: {}]   ;;  %s1455_s4 = inlined_call_operand.hbm [shape: f32[8,640], index: 4, kind: output, shape index: {0}]   ;;  %s1456_s5 = inlined_call_operand.hbm [shape: f32[8,640], index: 5, kind: output, shape index: {1}]  }
   0x1   :  { %12 = vsyncpa [#allocation6], 0 }
   0x2   :  { %13 = vsyncpa [#allocation9], 0 }
   0x3   :  { %14 = vsyncpa [#allocation4], 0  ;;  %s32_s20 = sshll.u32 %s1452_s1, 4  ;;  %s33_s20 = int_to_ptr.hbm [resolvable:$true] %s32_s20 }
   0x4   :  { %15 = vsyncpa [#allocation12], 0  ;;  %s1308_s21 = smov [#allocation5]   ;;  %s21_s25 = sshll.u32 %s1451_s0, 4  ;;  %s22_s25 = int_to_ptr.hbm [resolvable:$true] %s21_s25 }
   0x5   :  { %s34_s22 = sshll.u32 %s1308_s21, 4  ;;  %s1309_s26 = smov [#allocation2]   ;;  %s35_s22 = int_to_ptr.vmem [resolvable:$true] %s34_s22 }
   0x6   :  { %37 = dma.hbm_to_vmem [thread:$0]  %s33_s20, 640, %s35_s22, [#allocation6]  }
   0x7   :  { %s23_s27 = sshll.u32 %s1309_s26, 4  ;;  %s42_s30 = sshll.u32 %s1453_s2, 4  ;;  %s24_s27 = int_to_ptr.vmem [resolvable:$true] %s23_s27  ;;  %s43_s30 = int_to_ptr.hbm [resolvable:$true] %s42_s30 }
   0x8   :  { %26 = dma.hbm_to_vmem [thread:$0]  %s22_s25, 640, %s24_s27, [#allocation3]  }
   0x9   :  { %s1310_s1 = smov [#allocation7]   ;;  %s56_s9 = sshll.u32 %s1454_s3, 4  ;;  %s57_s9 = int_to_ptr.hbm [resolvable:$true] %s56_s9 }
   0xa   :  { %s44_s6 = sshll.u32 %s1310_s1, 4  ;;  %s1311_s10 = smov 640   ;;  %s45_s6 = int_to_ptr.vmem [resolvable:$true] %s44_s6 }
   0xb   :  { %s1312_s0 = smov 40   ;;  %s1313_s11 = smov [#allocation8]  }
   0xc   :  { %50 = dma.hbm_to_vmem [thread:$0]  %s43_s30, 51200, %s45_s6, [#allocation6], %s1311_s10, %s1311_s10, %s1312_s0  }
   0xd   :  { %s58_s12 = sshll.u32 %s1313_s11, 4  ;;  %s59_s12 = int_to_ptr.vmem [resolvable:$true] %s58_s12 }
   0xe   :  { %61 = dma.hbm_to_vmem [thread:$0]  %s57_s9, 80, %s59_s12, [#allocation9]  }
   0xf   :  { %1298 = dma.done.wait [#allocation3], 640  }
  0x10   :  { %1299 = vsyncadd [#allocation3], 4294966656 }
  0x11   :  { %1300 = dma.done.wait [#allocation6], 51840  }
  0x12   :  { %1301 = vsyncadd [#allocation6], 4294915456 }
  0x13   :  { %1302 = dma.done.wait [#allocation9], 80  }
  0x14   :  { %1303 = vsyncadd [#allocation9], 4294967216  ;;  %v163_v0 = vld [vmem:[#allocation7 + $0x258] sm:$0xff]  ;;  %v158_v2 = vld [vmem:[#allocation7 + $0x230] sm:$0xff]  ;;  %s1314_s2 = smov [#allocation10]   ;;  %s1092_s15 = sshll.u32 %s1455_s4, 4  ;;  %s1093_s15 = int_to_ptr.hbm [resolvable:$true] %s1092_s15 }
  0x15   :  { %v243_v1 = vld [vmem:[#allocation7 + $0x4d8] sm:$0xff]  ;;  %500 = vmatpush.msra.mxu0 %v163_v0  ;;  %v238_v3 = vld [vmem:[#allocation7 + $0x4b0] sm:$0xff]  ;;  %v153_v4 = vld [vmem:[#allocation7 + $0x208] sm:$0xff]  ;;  %s1090_s3 = sshll.u32 %s1314_s2, 4  ;;  %s1315_s16 = smov [#allocation11]   ;;  %s1091_s3 = int_to_ptr.vmem [resolvable:$true] %s1090_s3 }
  0x16   :  { %523 = vmatpush.msra.mxu1 %v243_v1  ;;  %v233_v5 = vld [vmem:[#allocation7 + $0x488] sm:$0xff]  ;;  %v148_v6 = vld [vmem:[#allocation7 + $0x1e0] sm:$0xff]  ;;  %v323_v8 = vld [vmem:[#allocation7 + $0x758] sm:$0xff]  ;;  %s1101_s17 = sshll.u32 %s1315_s16, 4  ;;  %s1103_s20 = sshll.u32 %s1456_s5, 4  ;;  %s1102_s17 = int_to_ptr.vmem [resolvable:$true] %s1101_s17  ;;  %s1104_s20 = int_to_ptr.hbm [resolvable:$true] %s1103_s20 }
  0x17   :  { %501 = vmatpush.msra.mxu0 %v158_v2  ;;  %v228_v7 = vld [vmem:[#allocation7 + $0x460] sm:$0xff]  ;;  %v318_v9 = vld [vmem:[#allocation7 + $0x730] sm:$0xff]  ;;  %v403_v10 = vld [vmem:[#allocation7 + $0x9d8] sm:$0xff]  ;;  %546 = vmatpush.msra.mxu2 %v323_v8 }
  0x18   :  { %524 = vmatpush.msra.mxu1 %v238_v3  ;;  %v143_v11 = vld [vmem:[#allocation7 + $0x1b8] sm:$0xff]  ;;  %569 = vmatpush.msra.mxu3 %v403_v10  ;;  %v398_v13 = vld [vmem:[#allocation7 + $0x9b0] sm:$0xff]  ;;  %v313_v14 = vld [vmem:[#allocation7 + $0x708] sm:$0xff] }
  0x19   :  { %502 = vmatpush.msra.mxu0 %v153_v4  ;;  %v223_v12 = vld [vmem:[#allocation7 + $0x438] sm:$0xff]  ;;  %v138_v15 = vld [vmem:[#allocation7 + $0x190] sm:$0xff]  ;;  %547 = vmatpush.msra.mxu2 %v318_v9  ;;  %v393_v17 = vld [vmem:[#allocation7 + $0x988] sm:$0xff] }
  0x1a   :  { %525 = vmatpush.msra.mxu1 %v233_v5  ;;  %v218_v16 = vld [vmem:[#allocation7 + $0x410] sm:$0xff]  ;;  %570 = vmatpush.msra.mxu3 %v398_v13  ;;  %v308_v18 = vld [vmem:[#allocation7 + $0x6e0] sm:$0xff]  ;;  %v133_v20 = vld [vmem:[#allocation7 + $0x168] sm:$0xff] }
  0x1b   :  { %503 = vmatpush.msra.mxu0 %v148_v6  ;;  %v388_v19 = vld [vmem:[#allocation7 + $0x960] sm:$0xff]  ;;  %v213_v21 = vld [vmem:[#allocation7 + $0x3e8] sm:$0xff]  ;;  %548 = vmatpush.msra.mxu2 %v313_v14  ;;  %v303_v22 = vld [vmem:[#allocation7 + $0x6b8] sm:$0xff] }
  0x1c   :  { %526 = vmatpush.msra.mxu1 %v228_v7  ;;  %571 = vmatpush.msra.mxu3 %v393_v17  ;;  %v383_v23 = vld [vmem:[#allocation7 + $0x938] sm:$0xff]  ;;  %v128_v24 = vld [vmem:[#allocation7 + $0x140] sm:$0xff]  ;;  %v298_v26 = vld [vmem:[#allocation7 + $0x690] sm:$0xff] }
  0x1d   :  { %504 = vmatpush.msra.mxu0 %v143_v11  ;;  %v208_v25 = vld [vmem:[#allocation7 + $0x3c0] sm:$0xff]  ;;  %549 = vmatpush.msra.mxu2 %v308_v18  ;;  %v378_v27 = vld [vmem:[#allocation7 + $0x910] sm:$0xff]  ;;  %v123_v28 = vld [vmem:[#allocation7 + $0x118] sm:$0xff] }
  0x1e   :  { %527 = vmatpush.msra.mxu1 %v223_v12  ;;  %572 = vmatpush.msra.mxu3 %v388_v19  ;;  %v203_v29 = vld [vmem:[#allocation7 + $0x398] sm:$0xff]  ;;  %v293_v30 = vld [vmem:[#allocation7 + $0x668] sm:$0xff]  ;;  %v118_v32 = vld [vmem:[#allocation7 + $0xf0] sm:$0xff] }
  0x1f   :  { %505 = vmatpush.msra.mxu0 %v138_v15  ;;  %550 = vmatpush.msra.mxu2 %v303_v22  ;;  %v373_v31 = vld [vmem:[#allocation7 + $0x8e8] sm:$0xff]  ;;  %v198_v33 = vld [vmem:[#allocation7 + $0x370] sm:$0xff]  ;;  %v288_v34 = vld [vmem:[#allocation7 + $0x640] sm:$0xff] }
  0x20   :  { %528 = vmatpush.msra.mxu1 %v218_v16  ;;  %573 = vmatpush.msra.mxu3 %v383_v23  ;;  %v368_v35 = vld [vmem:[#allocation7 + $0x8c0] sm:$0xff]  ;;  %v113_v36 = vld [vmem:[#allocation7 + $0xc8] sm:$0xff]  ;;  %v283_v38 = vld [vmem:[#allocation7 + $0x618] sm:$0xff] }
  0x21   :  { %506 = vmatpush.msra.mxu0 %v133_v20  ;;  %551 = vmatpush.msra.mxu2 %v298_v26  ;;  %v193_v37 = vld [vmem:[#allocation7 + $0x348] sm:$0xff]  ;;  %v363_v39 = vld [vmem:[#allocation7 + $0x898] sm:$0xff]  ;;  %v108_v40 = vld [vmem:[#allocation7 + $0xa0] sm:$0xff] }
  0x22   :  { %529 = vmatpush.msra.mxu1 %v213_v21  ;;  %574 = vmatpush.msra.mxu3 %v378_v27  ;;  %v188_v41 = vld [vmem:[#allocation7 + $0x320] sm:$0xff]  ;;  %v278_v42 = vld [vmem:[#allocation7 + $0x5f0] sm:$0xff]  ;;  %v103_v44 = vld [vmem:[#allocation7 + $0x78] sm:$0xff] }
  0x23   :  { %507 = vmatpush.msra.mxu0 %v128_v24  ;;  %552 = vmatpush.msra.mxu2 %v293_v30  ;;  %v358_v43 = vld [vmem:[#allocation7 + $0x870] sm:$0xff]  ;;  %v183_v45 = vld [vmem:[#allocation7 + $0x2f8] sm:$0xff]  ;;  %v273_v46 = vld [vmem:[#allocation7 + $0x5c8] sm:$0xff] }
  0x24   :  { %530 = vmatpush.msra.mxu1 %v208_v25  ;;  %575 = vmatpush.msra.mxu3 %v373_v31  ;;  %v353_v47 = vld [vmem:[#allocation7 + $0x848] sm:$0xff]  ;;  %v98_v48 = vld [vmem:[#allocation7 + $0x50] sm:$0xff]  ;;  %v268_v50 = vld [vmem:[#allocation7 + $0x5a0] sm:$0xff] }
  0x25   :  { %508 = vmatpush.msra.mxu0 %v123_v28  ;;  %553 = vmatpush.msra.mxu2 %v288_v34  ;;  %v178_v49 = vld [vmem:[#allocation7 + $0x2d0] sm:$0xff]  ;;  %v348_v51 = vld [vmem:[#allocation7 + $0x820] sm:$0xff]  ;;  %v93_v52 = vld [vmem:[#allocation7 + $0x28] sm:$0xff] }
  0x26   :  { %531 = vmatpush.msra.mxu1 %v203_v29  ;;  %576 = vmatpush.msra.mxu3 %v368_v35  ;;  %v173_v53 = vld [vmem:[#allocation7 + $0x2a8] sm:$0xff]  ;;  %v263_v54 = vld [vmem:[#allocation7 + $0x578] sm:$0xff]  ;;  %v88_v56 = vld [vmem:[#allocation7] sm:$0xff] }
  0x27   :  { %509 = vmatpush.msra.mxu0 %v118_v32  ;;  %554 = vmatpush.msra.mxu2 %v283_v38  ;;  %v343_v55 = vld [vmem:[#allocation7 + $0x7f8] sm:$0xff]  ;;  %v168_v57 = vld [vmem:[#allocation7 + $0x280] sm:$0xff]  ;;  %v258_v60 = vld [vmem:[#allocation7 + $0x550] sm:$0xff] }
  0x28   :  { %532 = vmatpush.msra.mxu1 %v198_v33  ;;  %577 = vmatpush.msra.mxu3 %v363_v39  ;;  %v483_v58 = vld [vmem:[#allocation7 + $0xc58] sm:$0xff]  ;;  %v164_v59 = vld [vmem:[#allocation7 + $0x260] sm:$0xff]  ;;  %v338_v61 = vld [vmem:[#allocation7 + $0x7d0] sm:$0xff] }
  0x29   :  { %510 = vmatpush.msra.mxu0 %v113_v36  ;;  %555 = vmatpush.msra.mxu2 %v278_v42  ;;  %v478_v62 = vld [vmem:[#allocation7 + $0xc30] sm:$0xff]  ;;  %v159_v63 = vld [vmem:[#allocation7 + $0x238] sm:$0xff]  ;;  %v253_v0 = vld [vmem:[#allocation7 + $0x528] sm:$0xff] }
  0x2a   :  { %533 = vmatpush.msra.mxu1 %v193_v37  ;;  %578 = vmatpush.msra.mxu3 %v358_v43  ;;  %v333_v1 = vld [vmem:[#allocation7 + $0x7a8] sm:$0xff]  ;;  %v154_v3 = vld [vmem:[#allocation7 + $0x210] sm:$0xff]  ;;  %v248_v4 = vld [vmem:[#allocation7 + $0x500] sm:$0xff] }
  0x2b   :  { %511 = vmatpush.msra.mxu0 %v108_v40  ;;  %556 = vmatpush.msra.mxu2 %v273_v46  ;;  %v473_v2 = vld [vmem:[#allocation7 + $0xc08] sm:$0xff]  ;;  %v328_v5 = vld [vmem:[#allocation7 + $0x780] sm:$0xff]  ;;  %v463_v10 = vld [vmem:[#allocation7 + $0xbb8] sm:$0xff] }
  0x2c   :  { %534 = vmatpush.msra.mxu1 %v188_v41  ;;  %579 = vmatpush.msra.mxu3 %v353_v47  ;;  %v468_v6 = vld [vmem:[#allocation7 + $0xbe0] sm:$0xff]  ;;  %v149_v7 = vld [vmem:[#allocation7 + $0x1e8] sm:$0xff]  ;;  %v239_v12 = vld [vmem:[#allocation7 + $0x4b8] sm:$0xff] }
  0x2d   :  { %512 = vmatpush.msra.mxu0 %v103_v44  ;;  %557 = vmatpush.msra.mxu2 %v268_v50  ;;  %v244_v8 = vld [vmem:[#allocation7 + $0x4e0] sm:$0xff]  ;;  %v319_v13 = vld [vmem:[#allocation7 + $0x738] sm:$0xff]  ;;  %v458_v14 = vld [vmem:[#allocation7 + $0xb90] sm:$0xff] }
  0x2e   :  { %535 = vmatpush.msra.mxu1 %v183_v45  ;;  %580 = vmatpush.msra.mxu3 %v348_v51  ;;  %v324_v9 = vld [vmem:[#allocation7 + $0x760] sm:$0xff]  ;;  %v139_v15 = vld [vmem:[#allocation7 + $0x198] sm:$0xff]  ;;  %v234_v16 = vld [vmem:[#allocation7 + $0x490] sm:$0xff] }
  0x2f   :  { %513 = vmatpush.msra.mxu0 %v98_v48  ;;  %558 = vmatpush.msra.mxu2 %v263_v54  ;;  %v144_v11 = vld [vmem:[#allocation7 + $0x1c0] sm:$0xff]  ;;  %v314_v17 = vld [vmem:[#allocation7 + $0x710] sm:$0xff]  ;;  %v453_v18 = vld [vmem:[#allocation7 + $0xb68] sm:$0xff] }
  0x30   :  { %536 = vmatpush.msra.mxu1 %v178_v49  ;;  %581 = vmatpush.msra.mxu3 %v343_v55  ;;  %v134_v19 = vld [vmem:[#allocation7 + $0x170] sm:$0xff]  ;;  %v229_v20 = vld [vmem:[#allocation7 + $0x468] sm:$0xff]  ;;  %v448_v22 = vld [vmem:[#allocation7 + $0xb40] sm:$0xff] }
  0x31   :  { %514 = vmatpush.msra.mxu0 %v93_v52  ;;  %559 = vmatpush.msra.mxu2 %v258_v60  ;;  %v309_v21 = vld [vmem:[#allocation7 + $0x6e8] sm:$0xff]  ;;  %v224_v24 = vld [vmem:[#allocation7 + $0x440] sm:$0xff]  ;;  %v1358_v25 = vld [vmem:[#allocation2] sm:$0xff] }
  0x32   :  { %537 = vmatpush.msra.mxu1 %v173_v53  ;;  %582 = vmatpush.msra.mxu3 %v338_v61  ;;  %v129_v23 = vld [vmem:[#allocation7 + $0x148] sm:$0xff]  ;;  %v443_v26 = vld [vmem:[#allocation7 + $0xb18] sm:$0xff]  ;;  %v124_v27 = vld [vmem:[#allocation7 + $0x120] sm:$0xff] }
  0x33   :  { %515 = vmatpush.msra.mxu0 %v88_v56  ;;  %560 = vmatpush.msra.mxu2 %v253_v0  ;;  %v219_v28 = vld [vmem:[#allocation7 + $0x418] sm:$0xff]  ;;  %v304_v29 = vld [vmem:[#allocation7 + $0x6c0] sm:$0xff]  ;;  %v438_v30 = vld [vmem:[#allocation7 + $0xaf0] sm:$0xff] }
  0x34   :  { %538 = vmatpush.msra.mxu1 %v168_v57  ;;  %583 = vmatpush.msra.mxu3 %v333_v1  ;;  %v119_v31 = vld [vmem:[#allocation7 + $0xf8] sm:$0xff]  ;;  %v214_v32 = vld [vmem:[#allocation7 + $0x3f0] sm:$0xff]  ;;  %v433_v34 = vld [vmem:[#allocation7 + $0xac8] sm:$0xff] }
  0x35   :  { %592 = vmatpush.msrb.mxu0 %v483_v58  ;;  %561 = vmatpush.msra.mxu2 %v248_v4  ;;  %v299_v33 = vld [vmem:[#allocation7 + $0x698] sm:$0xff]  ;;  %v114_v35 = vld [vmem:[#allocation7 + $0xd0] sm:$0xff]  ;;  %v209_v36 = vld [vmem:[#allocation7 + $0x3c8] sm:$0xff] }
  0x36   :  { %615 = vmatpush.msrb.mxu1 %v164_v59  ;;  %584 = vmatpush.msra.mxu3 %v328_v5  ;;  %v294_v37 = vld [vmem:[#allocation7 + $0x670] sm:$0xff]  ;;  %v428_v38 = vld [vmem:[#allocation7 + $0xaa0] sm:$0xff]  ;;  %v109_v39 = vld [vmem:[#allocation7 + $0xa8] sm:$0xff] }
  0x37   :  { %593 = vmatpush.msrb.mxu0 %v478_v62  ;;  %638 = vmatpush.msrb.mxu2 %v244_v8  ;;  %v1361_v40 = vld [vmem:[#allocation2 + $0x10] sm:$0xff]  ;;  %v289_v41 = vld [vmem:[#allocation7 + $0x648] sm:$0xff]  ;;  %v423_v42 = vld [vmem:[#allocation7 + $0xa78] sm:$0xff] }
  0x38   :  { %616 = vmatpush.msrb.mxu1 %v159_v63  ;;  %661 = vmatpush.msrb.mxu3 %v324_v9  ;;  %v104_v43 = vld [vmem:[#allocation7 + $0x80] sm:$0xff]  ;;  %v1363_v45 = vld [vmem:[#allocation5] sm:$0xff]  ;;  %v418_v46 = vld [vmem:[#allocation7 + $0xa50] sm:$0xff] }
  0x39   :  { %594 = vmatpush.msrb.mxu0 %v473_v2  ;;  %639 = vmatpush.msrb.mxu2 %v239_v12  ;;  %v204_v44 = vld [vmem:[#allocation7 + $0x3a0] sm:$0xff]  ;;  %v99_v47 = vld [vmem:[#allocation7 + $0x58] sm:$0xff]  ;;  %v1366_v48 = vld [vmem:[#allocation2 + $0x18] sm:$0xff] }
  0x3a   :  { %617 = vmatpush.msrb.mxu1 %v154_v3  ;;  %662 = vmatpush.msrb.mxu3 %v319_v13  ;;  %v199_v49 = vld [vmem:[#allocation7 + $0x378] sm:$0xff]  ;;  %v413_v50 = vld [vmem:[#allocation7 + $0xa28] sm:$0xff]  ;;  %v94_v51 = vld [vmem:[#allocation7 + $0x30] sm:$0xff] }
  0x3b   :  { %595 = vmatpush.msrb.mxu0 %v468_v6  ;;  %640 = vmatpush.msrb.mxu2 %v234_v16  ;;  %v284_v52 = vld [vmem:[#allocation7 + $0x620] sm:$0xff]  ;;  %v1369_v53 = vld [vmem:[#allocation2 + $0x8] sm:$0xff]  ;;  %v89_v55 = vld [vmem:[#allocation7 + $0x8] sm:$0xff] }
  0x3c   :  { %618 = vmatpush.msrb.mxu1 %v149_v7  ;;  %663 = vmatpush.msrb.mxu3 %v314_v17  ;;  %v408_v54 = vld [vmem:[#allocation7 + $0xa00] sm:$0xff]  ;;  %v194_v56 = vld [vmem:[#allocation7 + $0x350] sm:$0xff]  ;;  %v279_v57 = vld [vmem:[#allocation7 + $0x5f8] sm:$0xff] }
  0x3d   :  { %596 = vmatpush.msrb.mxu0 %v463_v10  ;;  %641 = vmatpush.msrb.mxu2 %v229_v20  ;;  %v404_v58 = vld [vmem:[#allocation7 + $0x9e0] sm:$0xff]  ;;  %v189_v60 = vld [vmem:[#allocation7 + $0x328] sm:$0xff]  ;;  %v274_v61 = vld [vmem:[#allocation7 + $0x5d0] sm:$0xff] }
  0x3e   :  { %619 = vmatpush.msrb.mxu1 %v144_v11  ;;  %664 = vmatpush.msrb.mxu3 %v309_v21  ;;  %v484_v59 = vld [vmem:[#allocation7 + $0xc60] sm:$0xff]  ;;  %v399_v62 = vld [vmem:[#allocation7 + $0x9b8] sm:$0xff]  ;;  %v269_v1 = vld [vmem:[#allocation7 + $0x5a8] sm:$0xff] }
  0x3f   :  { %597 = vmatpush.msrb.mxu0 %v458_v14  ;;  %642 = vmatpush.msrb.mxu2 %v224_v24  ;;  %v479_v63 = vld [vmem:[#allocation7 + $0xc38] sm:$0xff]  ;;  %v184_v0 = vld [vmem:[#allocation7 + $0x300] sm:$0xff]  ;;  %v394_v2 = vld [vmem:[#allocation7 + $0x990] sm:$0xff] }
  0x40   :  { %620 = vmatpush.msrb.mxu1 %v139_v15  ;;  %516 = vmatmul.f32.vlgmr.msra.gmra.mxu0 %v1358_v25  ;;  %v474_v3 = vld [vmem:[#allocation7 + $0xc10] sm:$0xff]  ;;  %v179_v5 = vld [vmem:[#allocation7 + $0x2d8] sm:$0xff]  ;;  %v264_v6 = vld [vmem:[#allocation7 + $0x580] sm:$0xff] }
  0x41   :  { %598 = vmatpush.msrb.mxu0 %v453_v18  ;;  %643 = vmatpush.msrb.mxu2 %v219_v28  ;;  %v1373_v4 = vld [vmem:[#allocation2 + $0x20] sm:$0xff]  ;;  %v389_v7 = vld [vmem:[#allocation7 + $0x968] sm:$0xff]  ;;  %v259_v10 = vld [vmem:[#allocation7 + $0x558] sm:$0xff] }
  0x42   :  { %621 = vmatpush.msrb.mxu1 %v134_v19  ;;  %665 = vmatpush.msrb.mxu3 %v304_v29  ;;  %v469_v8 = vld [vmem:[#allocation7 + $0xbe8] sm:$0xff]  ;;  %v174_v9 = vld [vmem:[#allocation7 + $0x2b0] sm:$0xff]  ;;  %v384_v11 = vld [vmem:[#allocation7 + $0x940] sm:$0xff] }
  0x43   :  { %599 = vmatpush.msrb.mxu0 %v448_v22  ;;  %644 = vmatpush.msrb.mxu2 %v214_v32  ;;  %v464_v12 = vld [vmem:[#allocation7 + $0xbc0] sm:$0xff]  ;;  %v169_v13 = vld [vmem:[#allocation7 + $0x288] sm:$0xff]  ;;  %v254_v14 = vld [vmem:[#allocation7 + $0x530] sm:$0xff] }
  0x44   :  { %622 = vmatpush.msrb.mxu1 %v129_v23  ;;  %666 = vmatpush.msrb.mxu3 %v299_v33  ;;  %v379_v15 = vld [vmem:[#allocation7 + $0x918] sm:$0xff]  ;;  %v165_v17 = vld [vmem:[#allocation7 + $0x268] sm:$0xff]  ;;  %v374_v19 = vld [vmem:[#allocation7 + $0x8f0] sm:$0xff] }
  0x45   :  { %600 = vmatpush.msrb.mxu0 %v443_v26  ;;  %645 = vmatpush.msrb.mxu2 %v209_v36  ;;  %v459_v16 = vld [vmem:[#allocation7 + $0xb98] sm:$0xff]  ;;  %v249_v18 = vld [vmem:[#allocation7 + $0x508] sm:$0xff]  ;;  %v454_v20 = vld [vmem:[#allocation7 + $0xb70] sm:$0xff] }
  0x46   :  { %623 = vmatpush.msrb.mxu1 %v124_v27  ;;  %667 = vmatpush.msrb.mxu3 %v294_v37  ;;  %v160_v21 = vld [vmem:[#allocation7 + $0x240] sm:$0xff]  ;;  %v245_v22 = vld [vmem:[#allocation7 + $0x4e8] sm:$0xff]  ;;  %v155_v26 = vld [vmem:[#allocation7 + $0x218] sm:$0xff] }
  0x47   :  { %601 = vmatpush.msrb.mxu0 %v438_v30  ;;  %562 = vmatmul.f32.vlgmr.msra.gmra.mxu2 %v1361_v40  ;;  %v369_v23 = vld [vmem:[#allocation7 + $0x8c8] sm:$0xff]  ;;  %v1376_v27 = vld [vmem:[#allocation5 + $0x8] sm:$0xff]  ;;  %v235_v32 = vld [vmem:[#allocation7 + $0x498] sm:$0xff] }
  0x48   :  { %624 = vmatpush.msrb.mxu1 %v119_v31  ;;  %668 = vmatpush.msrb.mxu3 %v289_v41  ;;  %v449_v24 = vld [vmem:[#allocation7 + $0xb48] sm:$0xff]  ;;  %v240_v28 = vld [vmem:[#allocation7 + $0x4c0] sm:$0xff]  ;;  %v150_v31 = vld [vmem:[#allocation7 + $0x1f0] sm:$0xff] }
  0x49   :  { %602 = vmatpush.msrb.mxu0 %v433_v34  ;;  %646 = vmatpush.msrb.mxu2 %v204_v44  ;;  %v364_v29 = vld [vmem:[#allocation7 + $0x8a0] sm:$0xff]  ;;  %v359_v33 = vld [vmem:[#allocation7 + $0x878] sm:$0xff]  ;;  %v230_v36 = vld [vmem:[#allocation7 + $0x470] sm:$0xff] }
  0x4a   :  { %625 = vmatpush.msrb.mxu1 %v114_v35  ;;  %519 = vmatmul.f32.gmra.mxu0 %v1363_v45  ;;  %v444_v30 = vld [vmem:[#allocation7 + $0xb20] sm:$0xff]  ;;  %v439_v34 = vld [vmem:[#allocation7 + $0xaf8] sm:$0xff]  ;;  %v1379_v35 = vld [vmem:[#allocation5 + $0x10] sm:$0xff] }
  0x4b   :  { %603 = vmatpush.msrb.mxu0 %v428_v38  ;;  %585 = vmatmul.f32.vlgmr.msra.gmra.mxu3 %v1366_v48  ;;  %v145_v37 = vld [vmem:[#allocation7 + $0x1c8] sm:$0xff]  ;;  %v354_v38 = vld [vmem:[#allocation7 + $0x850] sm:$0xff] }
  0x4c   :  { %626 = vmatpush.msrb.mxu1 %v109_v39  ;;  %647 = vmatpush.msrb.mxu2 %v199_v49  ;;  %v434_v39 = vld [vmem:[#allocation7 + $0xad0] sm:$0xff]  ;;  %v349_v44 = vld [vmem:[#allocation7 + $0x828] sm:$0xff]  ;;  %v220_v49 = vld [vmem:[#allocation7 + $0x420] sm:$0xff] }
  0x4d   :  { %604 = vmatpush.msrb.mxu0 %v423_v42  ;;  %669 = vmatpush.msrb.mxu3 %v284_v52  ;;  %v1381_v41 = vld [vmem:[#allocation5 + $0x18] sm:$0xff]  ;;  %v140_v42 = vld [vmem:[#allocation7 + $0x1a0] sm:$0xff] }
  0x4e   :  { %627 = vmatpush.msrb.mxu1 %v104_v43  ;;  %648 = vmatpush.msrb.mxu2 %v194_v56  ;;  %v225_v43 = vld [vmem:[#allocation7 + $0x448] sm:$0xff]  ;;  %v130_v52 = vld [vmem:[#allocation7 + $0x150] sm:$0xff]  ;;  %v419_v56 = vld [vmem:[#allocation7 + $0xa58] sm:$0xff] }
  0x4f   :  { %605 = vmatpush.msrb.mxu0 %v418_v46  ;;  %539 = vmatmul.f32.vlgmr.msra.gmra.mxu1 %v1369_v53  ;;  %v429_v46 = vld [vmem:[#allocation7 + $0xaa8] sm:$0xff] }
  0x50   :  { %628 = vmatpush.msrb.mxu1 %v99_v47  ;;  %670 = vmatpush.msrb.mxu3 %v279_v57  ;;  %v135_v47 = vld [vmem:[#allocation7 + $0x178] sm:$0xff]  ;;  %v125_v57 = vld [vmem:[#allocation7 + $0x128] sm:$0xff] }
  0x51   :  { %606 = vmatpush.msrb.mxu0 %v413_v50  ;;  %649 = vmatpush.msrb.mxu2 %v189_v60  ;;  %v344_v50 = vld [vmem:[#allocation7 + $0x800] sm:$0xff]  ;;  %v414_v60 = vld [vmem:[#allocation7 + $0xa30] sm:$0xff] }
  0x52   :  { %629 = vmatpush.msrb.mxu1 %v94_v51  ;;  %671 = vmatpush.msrb.mxu3 %v274_v61  ;;  %v424_v51 = vld [vmem:[#allocation7 + $0xa80] sm:$0xff]  ;;  %v1387_v61 = vld [vmem:[#allocation5 + $0x20] sm:$0xff] }
  0x53   :  { %607 = vmatpush.msrb.mxu0 %v408_v54  ;;  %650 = vmatpush.msrb.mxu2 %v184_v0  ;;  %v215_v54 = vld [vmem:[#allocation7 + $0x3f8] sm:$0xff]  ;;  %v329_v0 = vld [vmem:[#allocation7 + $0x788] sm:$0xff] }
  0x54   :  { %630 = vmatpush.msrb.mxu1 %v89_v55  ;;  %672 = vmatpush.msrb.mxu3 %v269_v1  ;;  %v339_v55 = vld [vmem:[#allocation7 + $0x7d8] sm:$0xff]  ;;  %v409_v1 = vld [vmem:[#allocation7 + $0xa08] sm:$0xff] }
  0x55   :  { %684 = vmatpush.msra.mxu0 %v404_v58  ;;  %651 = vmatpush.msrb.mxu2 %v179_v5  ;;  %v210_v58 = vld [vmem:[#allocation7 + $0x3d0] sm:$0xff]  ;;  %v325_v5 = vld [vmem:[#allocation7 + $0x768] sm:$0xff] }
  0x56   :  { %707 = vmatpush.msra.mxu1 %v484_v59  ;;  %608 = vmatmul.f32.vlgmr.msrb.gmra.mxu0 %v1373_v4  ;;  %v334_v59 = vld [vmem:[#allocation7 + $0x7b0] sm:$0xff] }
  0x57   :  { %685 = vmatpush.msra.mxu0 %v399_v62  ;;  %673 = vmatpush.msrb.mxu3 %v264_v6  ;;  %v120_v62 = vld [vmem:[#allocation7 + $0x100] sm:$0xff]  ;;  %v405_v6 = vld [vmem:[#allocation7 + $0x9e8] sm:$0xff] }
  0x58   :  { %708 = vmatpush.msra.mxu1 %v479_v63  ;;  %652 = vmatpush.msrb.mxu2 %v174_v9  ;;  %v205_v63 = vld [vmem:[#allocation7 + $0x3a8] sm:$0xff]  ;;  %v320_v9 = vld [vmem:[#allocation7 + $0x740] sm:$0xff] }
  0x59   :  { %686 = vmatpush.msra.mxu0 %v394_v2  ;;  %674 = vmatpush.msrb.mxu3 %v259_v10  ;;  %v115_v2 = vld [vmem:[#allocation7 + $0xd8] sm:$0xff]  ;;  %v400_v10 = vld [vmem:[#allocation7 + $0x9c0] sm:$0xff] }
  0x5a   :  { %709 = vmatpush.msra.mxu1 %v474_v3  ;;  %653 = vmatpush.msrb.mxu2 %v169_v13  ;;  %v200_v3 = vld [vmem:[#allocation7 + $0x380] sm:$0xff]  ;;  %v315_v13 = vld [vmem:[#allocation7 + $0x718] sm:$0xff] }
  0x5b   :  { %687 = vmatpush.msra.mxu0 %v389_v7  ;;  %675 = vmatpush.msrb.mxu3 %v254_v14  ;;  %v110_v7 = vld [vmem:[#allocation7 + $0xb0] sm:$0xff]  ;;  %v395_v14 = vld [vmem:[#allocation7 + $0x998] sm:$0xff] }
  0x5c   :  { %710 = vmatpush.msra.mxu1 %v469_v8  ;;  %730 = vmatpush.msra.mxu2 %v165_v17  ;;  %v195_v8 = vld [vmem:[#allocation7 + $0x358] sm:$0xff]  ;;  %v310_v17 = vld [vmem:[#allocation7 + $0x6f0] sm:$0xff] }
  0x5d   :  { %688 = vmatpush.msra.mxu0 %v384_v11  ;;  %676 = vmatpush.msrb.mxu3 %v249_v18  ;;  %v105_v11 = vld [vmem:[#allocation7 + $0x88] sm:$0xff]  ;;  %v390_v18 = vld [vmem:[#allocation7 + $0x970] sm:$0xff] }
  0x5e   :  { %711 = vmatpush.msra.mxu1 %v464_v12  ;;  %731 = vmatpush.msra.mxu2 %v160_v21  ;;  %v190_v12 = vld [vmem:[#allocation7 + $0x330] sm:$0xff]  ;;  %v305_v21 = vld [vmem:[#allocation7 + $0x6c8] sm:$0xff] }
  0x5f   :  { %689 = vmatpush.msra.mxu0 %v379_v15  ;;  %753 = vmatpush.msra.mxu3 %v245_v22  ;;  %v100_v15 = vld [vmem:[#allocation7 + $0x60] sm:$0xff]  ;;  %v385_v22 = vld [vmem:[#allocation7 + $0x948] sm:$0xff] }
  0x60   :  { %712 = vmatpush.msra.mxu1 %v459_v16  ;;  %732 = vmatpush.msra.mxu2 %v155_v26  ;;  %v185_v16 = vld [vmem:[#allocation7 + $0x308] sm:$0xff]  ;;  %v300_v26 = vld [vmem:[#allocation7 + $0x6a0] sm:$0xff] }
  0x61   :  { %690 = vmatpush.msra.mxu0 %v374_v19  ;;  %542 = vmatmul.f32.gmra.mxu1 %v1376_v27  ;;  %v95_v19 = vld [vmem:[#allocation7 + $0x38] sm:$0xff] }
  0x62   :  { %713 = vmatpush.msra.mxu1 %v454_v20  ;;  %754 = vmatpush.msra.mxu3 %v240_v28  ;;  %v180_v20 = vld [vmem:[#allocation7 + $0x2e0] sm:$0xff] }
  0x63   :  { %691 = vmatpush.msra.mxu0 %v369_v23  ;;  %733 = vmatpush.msra.mxu2 %v150_v31  ;;  %v90_v23 = vld [vmem:[#allocation7 + $0x10] sm:$0xff]  ;;  %v380_v28 = vld [vmem:[#allocation7 + $0x920] sm:$0xff]  ;;  %v295_v31 = vld [vmem:[#allocation7 + $0x678] sm:$0xff] }
  0x64   :  { %714 = vmatpush.msra.mxu1 %v449_v24  ;;  %755 = vmatpush.msra.mxu3 %v235_v32  ;;  %v175_v24 = vld [vmem:[#allocation7 + $0x2b8] sm:$0xff] }
  0x65   :  { %692 = vmatpush.msra.mxu0 %v364_v29  ;;  %565 = vmatmul.f32.gmra.mxu2 %v1379_v35  ;;  %v485_v29 = vld [vmem:[#allocation7 + $0xc68] sm:$0xff]  ;;  %v375_v32 = vld [vmem:[#allocation7 + $0x8f8] sm:$0xff] }
  0x66   :  { %715 = vmatpush.msra.mxu1 %v444_v30  ;;  %756 = vmatpush.msra.mxu3 %v230_v36  ;;  %v170_v30 = vld [vmem:[#allocation7 + $0x290] sm:$0xff] }
  0x67   :  { %693 = vmatpush.msra.mxu0 %v359_v33  ;;  %734 = vmatpush.msra.mxu2 %v145_v37  ;;  %v480_v33 = vld [vmem:[#allocation7 + $0xc40] sm:$0xff]  ;;  %v290_v36 = vld [vmem:[#allocation7 + $0x650] sm:$0xff] }
  0x68   :  { %716 = vmatpush.msra.mxu1 %v439_v34  ;;  %588 = vmatmul.f32.gmra.mxu3 %v1381_v41  ;;  %v166_v34 = vld [vmem:[#allocation7 + $0x270] sm:$0xff] }
  0x69   :  { %694 = vmatpush.msra.mxu0 %v354_v38  ;;  %735 = vmatpush.msra.mxu2 %v140_v42  ;;  %v370_v37 = vld [vmem:[#allocation7 + $0x8d0] sm:$0xff]  ;;  %v475_v38 = vld [vmem:[#allocation7 + $0xc18] sm:$0xff]  ;;  %v285_v42 = vld [vmem:[#allocation7 + $0x628] sm:$0xff] }
  0x6a   :  { %717 = vmatpush.msra.mxu1 %v434_v39  ;;  %757 = vmatpush.msra.mxu3 %v225_v43  ;;  %v161_v39 = vld [vmem:[#allocation7 + $0x248] sm:$0xff] }
  0x6b   :  { %695 = vmatpush.msra.mxu0 %v349_v44  ;;  %631 = vmatmul.f32.vlgmr.msrb.gmra.mxu1 %v1358_v25  ;;  %v365_v43 = vld [vmem:[#allocation7 + $0x8a8] sm:$0xff]  ;;  %v470_v44 = vld [vmem:[#allocation7 + $0xbf0] sm:$0xff] }
  0x6c   :  { %718 = vmatpush.msra.mxu1 %v429_v46  ;;  %736 = vmatpush.msra.mxu2 %v135_v47  ;;  %v156_v46 = vld [vmem:[#allocation7 + $0x220] sm:$0xff] }
  0x6d   :  { %758 = vmatpush.msra.mxu3 %v220_v49  ;;  %696 = vmatpush.msra.mxu0 %v344_v50  ;;  %v280_v47 = vld [vmem:[#allocation7 + $0x600] sm:$0xff]  ;;  %v465_v50 = vld [vmem:[#allocation7 + $0xbc8] sm:$0xff] }
  0x6e   :  { %719 = vmatpush.msra.mxu1 %v424_v51  ;;  %737 = vmatpush.msra.mxu2 %v130_v52  ;;  %v360_v49 = vld [vmem:[#allocation7 + $0x880] sm:$0xff]  ;;  %v151_v51 = vld [vmem:[#allocation7 + $0x1f8] sm:$0xff] }
  0x6f   :  { %759 = vmatpush.msra.mxu3 %v215_v54  ;;  %697 = vmatpush.msra.mxu0 %v339_v55  ;;  %v275_v52 = vld [vmem:[#allocation7 + $0x5d8] sm:$0xff]  ;;  %v460_v55 = vld [vmem:[#allocation7 + $0xba0] sm:$0xff] }
  0x70   :  { %720 = vmatpush.msra.mxu1 %v419_v56  ;;  %654 = vmatmul.f32.vlgmr.msrb.gmra.mxu2 %v1369_v53  ;;  %v355_v54 = vld [vmem:[#allocation7 + $0x858] sm:$0xff]  ;;  %v146_v56 = vld [vmem:[#allocation7 + $0x1d0] sm:$0xff] }
  0x71   :  { %738 = vmatpush.msra.mxu2 %v125_v57  ;;  %760 = vmatpush.msra.mxu3 %v210_v58  ;;  %v270_v57 = vld [vmem:[#allocation7 + $0x5b0] sm:$0xff] }
  0x72   :  { %698 = vmatpush.msra.mxu0 %v334_v59  ;;  %721 = vmatpush.msra.mxu1 %v414_v60  ;;  %v350_v58 = vld [vmem:[#allocation7 + $0x830] sm:$0xff]  ;;  %v455_v59 = vld [vmem:[#allocation7 + $0xb78] sm:$0xff]  ;;  %v141_v60 = vld [vmem:[#allocation7 + $0x1a8] sm:$0xff] }
  0x73   :  { %611 = vmatmul.f32.gmra.mxu0 %v1387_v61  ;;  %677 = vmatmul.f32.vlgmr.msrb.gmra.mxu3 %v1361_v40 }
  0x74   :  { %739 = vmatpush.msra.mxu2 %v120_v62  ;;  %761 = vmatpush.msra.mxu3 %v205_v63  ;;  %v265_v62 = vld [vmem:[#allocation7 + $0x588] sm:$0xff] }
  0x75   :  { %699 = vmatpush.msra.mxu0 %v329_v0  ;;  %722 = vmatpush.msra.mxu1 %v409_v1  ;;  %v345_v63 = vld [vmem:[#allocation7 + $0x808] sm:$0xff]  ;;  %v450_v0 = vld [vmem:[#allocation7 + $0xb50] sm:$0xff]  ;;  %v136_v1 = vld [vmem:[#allocation7 + $0x180] sm:$0xff] }
  0x76   :  { %634 = vmatmul.f32.gmra.mxu1 %v1363_v45  ;;  %740 = vmatpush.msra.mxu2 %v115_v2  ;;  %v260_v2 = vld [vmem:[#allocation7 + $0x560] sm:$0xff] }
  0x77   :  { %762 = vmatpush.msra.mxu3 %v200_v3  ;;  %776 = vmatpush.msrb.mxu0 %v325_v5  ;;  %v340_v3 = vld [vmem:[#allocation7 + $0x7e0] sm:$0xff]  ;;  %v445_v5 = vld [vmem:[#allocation7 + $0xb28] sm:$0xff] }
  0x78   :  { %799 = vmatpush.msrb.mxu1 %v405_v6  ;;  %741 = vmatpush.msra.mxu2 %v110_v7  ;;  %v131_v6 = vld [vmem:[#allocation7 + $0x158] sm:$0xff] }
  0x79   :  { %763 = vmatpush.msra.mxu3 %v195_v8  ;;  %777 = vmatpush.msrb.mxu0 %v320_v9  ;;  %v255_v7 = vld [vmem:[#allocation7 + $0x538] sm:$0xff]  ;;  %v440_v9 = vld [vmem:[#allocation7 + $0xb00] sm:$0xff] }
  0x7a   :  { %800 = vmatpush.msrb.mxu1 %v400_v10  ;;  %742 = vmatpush.msra.mxu2 %v105_v11  ;;  %v335_v8 = vld [vmem:[#allocation7 + $0x7b8] sm:$0xff]  ;;  %v126_v10 = vld [vmem:[#allocation7 + $0x130] sm:$0xff] }
  0x7b   :  { %764 = vmatpush.msra.mxu3 %v190_v12  ;;  %778 = vmatpush.msrb.mxu0 %v315_v13  ;;  %v250_v11 = vld [vmem:[#allocation7 + $0x510] sm:$0xff]  ;;  %v435_v13 = vld [vmem:[#allocation7 + $0xad8] sm:$0xff] }
  0x7c   :  { %801 = vmatpush.msrb.mxu1 %v395_v14  ;;  %700 = vmatmul.f32.vlgmr.msra.gmra.mxu0 %v1366_v48  ;;  %v330_v12 = vld [vmem:[#allocation7 + $0x790] sm:$0xff]  ;;  %v121_v14 = vld [vmem:[#allocation7 + $0x108] sm:$0xff] }
  0x7d   :  { %743 = vmatpush.msra.mxu2 %v100_v15  ;;  %765 = vmatpush.msra.mxu3 %v185_v16  ;;  %v246_v15 = vld [vmem:[#allocation7 + $0x4f0] sm:$0xff] }
  0x7e   :  { %779 = vmatpush.msrb.mxu0 %v310_v17  ;;  %802 = vmatpush.msrb.mxu1 %v390_v18  ;;  %v326_v16 = vld [vmem:[#allocation7 + $0x770] sm:$0xff]  ;;  %v116_v18 = vld [vmem:[#allocation7 + $0xe0] sm:$0xff] }
  0x7f   :  { %723 = vmatmul.f32.vlgmr.msra.gmra.mxu1 %v1373_v4  ;;  %744 = vmatpush.msra.mxu2 %v95_v19  ;;  %v430_v17 = vld [vmem:[#allocation7 + $0xab0] sm:$0xff]  ;;  %v241_v19 = vld [vmem:[#allocation7 + $0x4c8] sm:$0xff] }
  0x80   :  { %766 = vmatpush.msra.mxu3 %v180_v20  ;;  %780 = vmatpush.msrb.mxu0 %v305_v21  ;;  %v321_v20 = vld [vmem:[#allocation7 + $0x748] sm:$0xff] }
  0x81   :  { %803 = vmatpush.msrb.mxu1 %v385_v22  ;;  %745 = vmatpush.msra.mxu2 %v90_v23  ;;  %v425_v21 = vld [vmem:[#allocation7 + $0xa88] sm:$0xff]  ;;  %v111_v22 = vld [vmem:[#allocation7 + $0xb8] sm:$0xff]  ;;  %v236_v23 = vld [vmem:[#allocation7 + $0x4a0] sm:$0xff] }
  0x82   :  { %767 = vmatpush.msra.mxu3 %v175_v24  ;;  %781 = vmatpush.msrb.mxu0 %v300_v26  ;;  %v316_v24 = vld [vmem:[#allocation7 + $0x720] sm:$0xff] }
  0x83   :  { %804 = vmatpush.msrb.mxu1 %v380_v28  ;;  %822 = vmatpush.msrb.mxu2 %v485_v29  ;;  %v420_v26 = vld [vmem:[#allocation7 + $0xa60] sm:$0xff]  ;;  %v106_v28 = vld [vmem:[#allocation7 + $0x90] sm:$0xff]  ;;  %v231_v29 = vld [vmem:[#allocation7 + $0x478] sm:$0xff] }
  0x84   :  { %768 = vmatpush.msra.mxu3 %v170_v30  ;;  %782 = vmatpush.msrb.mxu0 %v295_v31  ;;  %v311_v30 = vld [vmem:[#allocation7 + $0x6f8] sm:$0xff] }
  0x85   :  { %805 = vmatpush.msrb.mxu1 %v375_v32  ;;  %823 = vmatpush.msrb.mxu2 %v480_v33  ;;  %v415_v31 = vld [vmem:[#allocation7 + $0xa38] sm:$0xff]  ;;  %v101_v32 = vld [vmem:[#allocation7 + $0x68] sm:$0xff]  ;;  %v226_v33 = vld [vmem:[#allocation7 + $0x450] sm:$0xff] }
  0x86   :  { %845 = vmatpush.msrb.mxu3 %v166_v34  ;;  %783 = vmatpush.msrb.mxu0 %v290_v36  ;;  %v306_v34 = vld [vmem:[#allocation7 + $0x6d0] sm:$0xff] }
  0x87   :  { %806 = vmatpush.msrb.mxu1 %v370_v37  ;;  %824 = vmatpush.msrb.mxu2 %v475_v38  ;;  %v410_v36 = vld [vmem:[#allocation7 + $0xa10] sm:$0xff]  ;;  %v96_v37 = vld [vmem:[#allocation7 + $0x40] sm:$0xff]  ;;  %v221_v38 = vld [vmem:[#allocation7 + $0x428] sm:$0xff] }
  0x88   :  { %846 = vmatpush.msrb.mxu3 %v161_v39  ;;  %784 = vmatpush.msrb.mxu0 %v285_v42  ;;  %v301_v39 = vld [vmem:[#allocation7 + $0x6a8] sm:$0xff]  ;;  %v406_v42 = vld [vmem:[#allocation7 + $0x9f0] sm:$0xff] }
  0x89   :  { %807 = vmatpush.msrb.mxu1 %v365_v43  ;;  %825 = vmatpush.msrb.mxu2 %v470_v44  ;;  %v91_v43 = vld [vmem:[#allocation7 + $0x18] sm:$0xff]  ;;  %v216_v44 = vld [vmem:[#allocation7 + $0x400] sm:$0xff] }
  0x8a   :  { %847 = vmatpush.msrb.mxu3 %v156_v46  ;;  %785 = vmatpush.msrb.mxu0 %v280_v47  ;;  %v296_v46 = vld [vmem:[#allocation7 + $0x680] sm:$0xff]  ;;  %v401_v47 = vld [vmem:[#allocation7 + $0x9c8] sm:$0xff] }
  0x8b   :  { %808 = vmatpush.msrb.mxu1 %v360_v49  ;;  %657 = vmatmul.f32.gmra.mxu2 %v1376_v27  ;;  %v486_v49 = vld [vmem:[#allocation7 + $0xc70] sm:$0xff] }
  0x8c   :  { %826 = vmatpush.msrb.mxu2 %v465_v50  ;;  %848 = vmatpush.msrb.mxu3 %v151_v51  ;;  %v211_v50 = vld [vmem:[#allocation7 + $0x3d8] sm:$0xff] }
  0x8d   :  { %786 = vmatpush.msrb.mxu0 %v275_v52  ;;  %809 = vmatpush.msrb.mxu1 %v355_v54  ;;  %v291_v51 = vld [vmem:[#allocation7 + $0x658] sm:$0xff]  ;;  %v396_v52 = vld [vmem:[#allocation7 + $0x9a0] sm:$0xff]  ;;  %v481_v54 = vld [vmem:[#allocation7 + $0xc48] sm:$0xff] }
  0x8e   :  { %680 = vmatmul.f32.gmra.mxu3 %v1379_v35  ;;  %827 = vmatpush.msrb.mxu2 %v460_v55  ;;  %v206_v55 = vld [vmem:[#allocation7 + $0x3b0] sm:$0xff] }
  0x8f   :  { %849 = vmatpush.msrb.mxu3 %v146_v56  ;;  %787 = vmatpush.msrb.mxu0 %v270_v57  ;;  %v286_v56 = vld [vmem:[#allocation7 + $0x630] sm:$0xff]  ;;  %v391_v57 = vld [vmem:[#allocation7 + $0x978] sm:$0xff] }
  0x90   :  { %810 = vmatpush.msrb.mxu1 %v350_v58  ;;  %828 = vmatpush.msrb.mxu2 %v455_v59  ;;  %v476_v58 = vld [vmem:[#allocation7 + $0xc20] sm:$0xff]  ;;  %v201_v59 = vld [vmem:[#allocation7 + $0x388] sm:$0xff] }
  0x91   :  { %850 = vmatpush.msrb.mxu3 %v141_v60  ;;  %788 = vmatpush.msrb.mxu0 %v265_v62  ;;  %v281_v60 = vld [vmem:[#allocation7 + $0x608] sm:$0xff]  ;;  %v386_v62 = vld [vmem:[#allocation7 + $0x950] sm:$0xff] }
  0x92   :  { %811 = vmatpush.msrb.mxu1 %v345_v63  ;;  %829 = vmatpush.msrb.mxu2 %v450_v0  ;;  %v471_v63 = vld [vmem:[#allocation7 + $0xbf8] sm:$0xff]  ;;  %v276_v0 = vld [vmem:[#allocation7 + $0x5e0] sm:$0xff] }
  0x93   :  { %851 = vmatpush.msrb.mxu3 %v136_v1  ;;  %789 = vmatpush.msrb.mxu0 %v260_v2  ;;  %v466_v1 = vld [vmem:[#allocation7 + $0xbd0] sm:$0xff]  ;;  %v381_v2 = vld [vmem:[#allocation7 + $0x928] sm:$0xff] }
  0x94   :  { %812 = vmatpush.msrb.mxu1 %v340_v3  ;;  %830 = vmatpush.msrb.mxu2 %v445_v5  ;;  %v191_v3 = vld [vmem:[#allocation7 + $0x338] sm:$0xff] }
  0x95   :  { %852 = vmatpush.msrb.mxu3 %v131_v6  ;;  %790 = vmatpush.msrb.mxu0 %v255_v7  ;;  %v271_v5 = vld [vmem:[#allocation7 + $0x5b8] sm:$0xff]  ;;  %v376_v6 = vld [vmem:[#allocation7 + $0x900] sm:$0xff]  ;;  %v461_v7 = vld [vmem:[#allocation7 + $0xba8] sm:$0xff] }
  0x96   :  { %813 = vmatpush.msrb.mxu1 %v335_v8  ;;  %703 = vmatmul.f32.gmra.mxu0 %v1381_v41  ;;  %v186_v8 = vld [vmem:[#allocation7 + $0x310] sm:$0xff] }
  0x97   :  { %831 = vmatpush.msrb.mxu2 %v440_v9  ;;  %853 = vmatpush.msrb.mxu3 %v126_v10  ;;  %v266_v9 = vld [vmem:[#allocation7 + $0x590] sm:$0xff]  ;;  %v371_v10 = vld [vmem:[#allocation7 + $0x8d8] sm:$0xff] }
  0x98   :  { %791 = vmatpush.msrb.mxu0 %v250_v11  ;;  %814 = vmatpush.msrb.mxu1 %v330_v12  ;;  %v456_v11 = vld [vmem:[#allocation7 + $0xb80] sm:$0xff]  ;;  %v181_v12 = vld [vmem:[#allocation7 + $0x2e8] sm:$0xff] }
  0x99   :  { %726 = vmatmul.f32.gmra.mxu1 %v1387_v61  ;;  %832 = vmatpush.msrb.mxu2 %v435_v13  ;;  %v261_v13 = vld [vmem:[#allocation7 + $0x568] sm:$0xff] }
  0x9a   :  { %854 = vmatpush.msrb.mxu3 %v121_v14  ;;  %868 = vmatpush.msra.mxu0 %v246_v15  ;;  %v366_v14 = vld [vmem:[#allocation7 + $0x8b0] sm:$0xff]  ;;  %v451_v15 = vld [vmem:[#allocation7 + $0xb58] sm:$0xff] }
  0x9b   :  { %891 = vmatpush.msra.mxu1 %v326_v16  ;;  %833 = vmatpush.msrb.mxu2 %v430_v17  ;;  %v176_v16 = vld [vmem:[#allocation7 + $0x2c0] sm:$0xff] }
  0x9c   :  { %855 = vmatpush.msrb.mxu3 %v116_v18  ;;  %869 = vmatpush.msra.mxu0 %v241_v19  ;;  %v256_v17 = vld [vmem:[#allocation7 + $0x540] sm:$0xff]  ;;  %v446_v18 = vld [vmem:[#allocation7 + $0xb30] sm:$0xff]  ;;  %v171_v19 = vld [vmem:[#allocation7 + $0x298] sm:$0xff] }
  0x9d   :  { %892 = vmatpush.msra.mxu1 %v321_v20  ;;  %834 = vmatpush.msrb.mxu2 %v425_v21  ;;  %v251_v20 = vld [vmem:[#allocation7 + $0x518] sm:$0xff]  ;;  %v356_v21 = vld [vmem:[#allocation7 + $0x860] sm:$0xff] }
  0x9e   :  { %856 = vmatpush.msrb.mxu3 %v111_v22  ;;  %870 = vmatpush.msra.mxu0 %v236_v23  ;;  %v441_v22 = vld [vmem:[#allocation7 + $0xb08] sm:$0xff]  ;;  %v247_v23 = vld [vmem:[#allocation7 + $0x4f8] sm:$0xff] }
  0x9f   :  { %893 = vmatpush.msra.mxu1 %v316_v24  ;;  %746 = vmatmul.f32.vlgmr.msra.gmra.mxu2 %v1358_v25  ;;  %v351_v24 = vld [vmem:[#allocation7 + $0x838] sm:$0xff] }
  0xa0   :  { %835 = vmatpush.msrb.mxu2 %v420_v26  ;;  %857 = vmatpush.msrb.mxu3 %v106_v28  ;;  %v436_v26 = vld [vmem:[#allocation7 + $0xae0] sm:$0xff]  ;;  %v162_v28 = vld [vmem:[#allocation7 + $0x250] sm:$0xff] }
  0xa1   :  { %871 = vmatpush.msra.mxu0 %v231_v29  ;;  %894 = vmatpush.msra.mxu1 %v311_v30  ;;  %v242_v29 = vld [vmem:[#allocation7 + $0x4d0] sm:$0xff] }
  0xa2   :  { %836 = vmatpush.msrb.mxu2 %v415_v31  ;;  %858 = vmatpush.msrb.mxu3 %v101_v32  ;;  %v346_v30 = vld [vmem:[#allocation7 + $0x810] sm:$0xff]  ;;  %v431_v31 = vld [vmem:[#allocation7 + $0xab8] sm:$0xff]  ;;  %v157_v32 = vld [vmem:[#allocation7 + $0x228] sm:$0xff] }
  0xa3   :  { %872 = vmatpush.msra.mxu0 %v226_v33  ;;  %895 = vmatpush.msra.mxu1 %v306_v34  ;;  %v237_v33 = vld [vmem:[#allocation7 + $0x4a8] sm:$0xff] }
  0xa4   :  { %837 = vmatpush.msrb.mxu2 %v410_v36  ;;  %859 = vmatpush.msrb.mxu3 %v96_v37  ;;  %v341_v34 = vld [vmem:[#allocation7 + $0x7e8] sm:$0xff]  ;;  %v426_v36 = vld [vmem:[#allocation7 + $0xa90] sm:$0xff]  ;;  %v152_v37 = vld [vmem:[#allocation7 + $0x200] sm:$0xff] }
  0xa5   :  { %873 = vmatpush.msra.mxu0 %v221_v38  ;;  %896 = vmatpush.msra.mxu1 %v301_v39  ;;  %v232_v39 = vld [vmem:[#allocation7 + $0x480] sm:$0xff] }
  0xa6   :  { %914 = vmatpush.msra.mxu2 %v406_v42  ;;  %860 = vmatpush.msrb.mxu3 %v91_v43  ;;  %v336_v42 = vld [vmem:[#allocation7 + $0x7c0] sm:$0xff]  ;;  %v421_v43 = vld [vmem:[#allocation7 + $0xa68] sm:$0xff] }
  0xa7   :  { %874 = vmatpush.msra.mxu0 %v216_v44  ;;  %897 = vmatpush.msra.mxu1 %v296_v46  ;;  %v147_v44 = vld [vmem:[#allocation7 + $0x1d8] sm:$0xff]  ;;  %v1406_v46 = vld [vmem:[#allocation8] sm:$0x1f] }
  0xa8   :  { %749 = vmatmul.f32.gmra.mxu2 %v1363_v45  ;;  %769 = vmatmul.f32.vlgmr.msra.gmra.mxu3 %v1369_v53  ;;  %v196_v53 = vld [vmem:[#allocation7 + $0x360] sm:$0xff] }
  0xa9   :  { %915 = vmatpush.msra.mxu2 %v401_v47  ;;  %937 = vmatpush.msra.mxu3 %v486_v49  ;;  %v227_v47 = vld [vmem:[#allocation7 + $0x458] sm:$0xff] }
  0xaa   :  { %875 = vmatpush.msra.mxu0 %v211_v50  ;;  %898 = vmatpush.msra.mxu1 %v291_v51  ;;  %v331_v49 = vld [vmem:[#allocation7 + $0x798] sm:$0xff]  ;;  %v416_v50 = vld [vmem:[#allocation7 + $0xa40] sm:$0xff]  ;;  %v142_v51 = vld [vmem:[#allocation7 + $0x1b0] sm:$0xff] }
  0xab   :  { %916 = vmatpush.msra.mxu2 %v396_v52  ;;  %938 = vmatpush.msra.mxu3 %v481_v54  ;;  %v222_v52 = vld [vmem:[#allocation7 + $0x430] sm:$0xff]  ;;  %v327_v54 = vld [vmem:[#allocation7 + $0x778] sm:$0xff] }
  0xac   :  { %876 = vmatpush.msra.mxu0 %v206_v55  ;;  %899 = vmatpush.msra.mxu1 %v286_v56  ;;  %v490_v55 = vperm.slane %v1406_v46, 0  ;;  %v137_v56 = vld [vmem:[#allocation7 + $0x188] sm:$0xff] }
  0xad   :  { %917 = vmatpush.msra.mxu2 %v391_v57  ;;  %939 = vmatpush.msra.mxu3 %v476_v58  ;;  %v217_v57 = vld [vmem:[#allocation7 + $0x408] sm:$0xff]  ;;  %v322_v58 = vld [vmem:[#allocation7 + $0x750] sm:$0xff] }
  0xae   :  { %877 = vmatpush.msra.mxu0 %v201_v59  ;;  %900 = vmatpush.msra.mxu1 %v281_v60  ;;  %v407_v59 = vld [vmem:[#allocation7 + $0x9f8] sm:$0xff] }
  0xaf   :  { %918 = vmatpush.msra.mxu2 %v386_v62  ;;  %940 = vmatpush.msra.mxu3 %v471_v63  ;;  %v132_v62 = vld [vmem:[#allocation7 + $0x160] sm:$0xff] }
  0xb0   :  { %878 = vmatpush.msra.mxu0 %v196_v53  ;;  %901 = vmatpush.msra.mxu1 %v276_v0  ;;  %v212_v63 = vld [vmem:[#allocation7 + $0x3e0] sm:$0xff]  ;;  %v317_v0 = vld [vmem:[#allocation7 + $0x728] sm:$0xff] }
  0xb1   :  { %838 = vmatmul.f32.vlgmr.msrb.gmra.mxu2 %v1373_v4  ;;  %941 = vmatpush.msra.mxu3 %v466_v1  ;;  %v402_v1 = vld [vmem:[#allocation7 + $0x9d0] sm:$0xff] }
  0xb2   :  { %919 = vmatpush.msra.mxu2 %v381_v2  ;;  %879 = vmatpush.msra.mxu0 %v191_v3  ;;  %v127_v2 = vld [vmem:[#allocation7 + $0x138] sm:$0xff] }
  0xb3   :  { %902 = vmatpush.msra.mxu1 %v271_v5  ;;  %792 = vmatmul.f32.vlgmr.msrb.gmra.mxu0 %v1361_v40  ;;  %v361_v40 = vld [vmem:[#allocation7 + $0x888] sm:$0xff] }
  0xb4   :  { %920 = vmatpush.msra.mxu2 %v376_v6  ;;  %942 = vmatpush.msra.mxu3 %v461_v7  ;;  %v207_v6 = vld [vmem:[#allocation7 + $0x3b8] sm:$0xff]  ;;  %v312_v7 = vld [vmem:[#allocation7 + $0x700] sm:$0xff] }
  0xb5   :  { %880 = vmatpush.msra.mxu0 %v186_v8  ;;  %903 = vmatpush.msra.mxu1 %v266_v9  ;;  %v397_v9 = vld [vmem:[#allocation7 + $0x9a8] sm:$0xff] }
  0xb6   :  { %815 = vmatmul.f32.vlgmr.msrb.gmra.mxu1 %v1366_v48  ;;  %921 = vmatpush.msra.mxu2 %v371_v10  ;;  %v167_v48 = vld [vmem:[#allocation7 + $0x278] sm:$0xff]  ;;  %v122_v10 = vld [vmem:[#allocation7 + $0x110] sm:$0xff] }
  0xb7   :  { %943 = vmatpush.msra.mxu3 %v456_v11  ;;  %881 = vmatpush.msra.mxu0 %v181_v12  ;;  %v202_v11 = vld [vmem:[#allocation7 + $0x390] sm:$0xff]  ;;  %v307_v12 = vld [vmem:[#allocation7 + $0x6d8] sm:$0xff] }
  0xb8   :  { %904 = vmatpush.msra.mxu1 %v261_v13  ;;  %922 = vmatpush.msra.mxu2 %v366_v14 }
  0xb9   :  { %944 = vmatpush.msra.mxu3 %v451_v15  ;;  %882 = vmatpush.msra.mxu0 %v176_v16  ;;  %v117_v15 = vld [vmem:[#allocation7 + $0xe8] sm:$0xff] }
  0xba   :  { %905 = vmatpush.msra.mxu1 %v256_v17  ;;  %772 = vmatmul.f32.gmra.mxu3 %v1376_v27  ;;  %v197_v16 = vld [vmem:[#allocation7 + $0x368] sm:$0xff] }
  0xbb   :  { %923 = vmatpush.msra.mxu2 %v361_v40  ;;  %945 = vmatpush.msra.mxu3 %v446_v18  ;;  %v302_v40 = vld [vmem:[#allocation7 + $0x6b0] sm:$0xff]  ;;  %v387_v18 = vld [vmem:[#allocation7 + $0x958] sm:$0xff] }
  0xbc   :  { %883 = vmatpush.msra.mxu0 %v171_v19  ;;  %906 = vmatpush.msra.mxu1 %v251_v20  ;;  %v1417_v19 = vld [vmem:[#allocation2 + $0x18] sm:$0xff]  ;;  %v112_v20 = vld [vmem:[#allocation7 + $0xc0] sm:$0xff] }
  0xbd   :  { %924 = vmatpush.msra.mxu2 %v356_v21  ;;  %946 = vmatpush.msra.mxu3 %v441_v22  ;;  %v517_v38 = vpop.f32.mrf.mxu0  ;;  %v192_v21 = vld [vmem:[#allocation7 + $0x340] sm:$0xff] }
  0xbe   :  { %960 = vmatpush.msrb.mxu0 %v167_v48  ;;  %983 = vmatpush.msrb.mxu1 %v247_v23  ;;  %v518_v60 = vadd.f32 %v517_v38, %v490_v55  ;;  %v297_v48 = vld [vmem:[#allocation7 + $0x688] sm:$0xff]  ;;  %v382_v23 = vld [vmem:[#allocation7 + $0x930] sm:$0xff] }
  0xbf   :  { %925 = vmatpush.msra.mxu2 %v351_v24  ;;  %947 = vmatpush.msra.mxu3 %v436_v26  ;;  %v1420_v26 = vld [vmem:[#allocation2 + $0x8] sm:$0xff]  ;;  %v177_v38 = vld [vmem:[#allocation7 + $0x2c8] sm:$0xff] }
  0xc0   :  { %961 = vmatpush.msrb.mxu0 %v162_v28  ;;  %984 = vmatpush.msrb.mxu1 %v242_v29  ;;  %v107_v28 = vld [vmem:[#allocation7 + $0x98] sm:$0xff] }
  0xc1   :  { %926 = vmatpush.msra.mxu2 %v346_v30  ;;  %948 = vmatpush.msra.mxu3 %v431_v31  ;;  %v187_v29 = vld [vmem:[#allocation7 + $0x318] sm:$0xff]  ;;  %v292_v30 = vld [vmem:[#allocation7 + $0x660] sm:$0xff]  ;;  %v377_v31 = vld [vmem:[#allocation7 + $0x908] sm:$0xff] }
  0xc2   :  { %962 = vmatpush.msrb.mxu0 %v157_v32  ;;  %985 = vmatpush.msrb.mxu1 %v237_v33  ;;  %v102_v32 = vld [vmem:[#allocation7 + $0x70] sm:$0xff]  ;;  %v1424_v33 = vld [vmem:[#allocation2 + $0x10] sm:$0xff] }
  0xc3   :  { %861 = vmatmul.f32.vlgmr.msrb.gmra.mxu3 %v1358_v25  ;;  %927 = vmatpush.msra.mxu2 %v341_v34  ;;  %v411_v25 = vld [vmem:[#allocation7 + $0xa18] sm:$0xff]  ;;  %v182_v34 = vld [vmem:[#allocation7 + $0x2f0] sm:$0xff] }
  0xc4   :  { %949 = vmatpush.msra.mxu3 %v426_v36  ;;  %963 = vmatpush.msrb.mxu0 %v152_v37  ;;  %v287_v36 = vld [vmem:[#allocation7 + $0x638] sm:$0xff]  ;;  %v97_v37 = vld [vmem:[#allocation7 + $0x48] sm:$0xff] }
  0xc5   :  { %986 = vmatpush.msrb.mxu1 %v232_v39  ;;  %928 = vmatpush.msra.mxu2 %v336_v42  ;;  %v282_v39 = vld [vmem:[#allocation7 + $0x610] sm:$0xff]  ;;  %v367_v42 = vld [vmem:[#allocation7 + $0x8b8] sm:$0xff] }
  0xc6   :  { %950 = vmatpush.msra.mxu3 %v421_v43  ;;  %964 = vmatpush.msrb.mxu0 %v147_v44  ;;  %v92_v43 = vld [vmem:[#allocation7 + $0x20] sm:$0xff] }
  0xc7   :  { %987 = vmatpush.msrb.mxu1 %v227_v47  ;;  %929 = vmatpush.msra.mxu2 %v331_v49  ;;  %v1412_v53 = vpop.f32.mrf.mxu0  ;;  %v172_v44 = vld [vmem:[#allocation7 + $0x2a0] sm:$0xff]  ;;  %v277_v47 = vld [vmem:[#allocation7 + $0x5e8] sm:$0xff]  ;;  %v362_v49 = vld [vmem:[#allocation7 + $0x890] sm:$0xff] }
  0xc8   :  { %951 = vmatpush.msra.mxu3 %v416_v50  ;;  %965 = vmatpush.msrb.mxu0 %v142_v51  ;;  %v487_v51 = vld [vmem:[#allocation7 + $0xc78] sm:$0xff] }
  0xc9   :  { %988 = vmatpush.msrb.mxu1 %v222_v52  ;;  %1006 = vmatpush.msrb.mxu2 %v327_v54  ;;  %v272_v52 = vld [vmem:[#allocation7 + $0x5c0] sm:$0xff]  ;;  %v357_v54 = vld [vmem:[#allocation7 + $0x868] sm:$0xff] }
  0xca   :  { %841 = vmatmul.f32.gmra.mxu2 %v1387_v61  ;;  %952 = vmatpush.msra.mxu3 %v411_v25  ;;  %v563_v5 = vpop.f32.mrf.mxu2  ;;  %v482_v25 = vld [vmem:[#allocation7 + $0xc50] sm:$0xff] }
  0xcb   :  { %966 = vmatpush.msrb.mxu0 %v137_v56  ;;  %989 = vmatpush.msrb.mxu1 %v217_v57  ;;  %v267_v56 = vld [vmem:[#allocation7 + $0x598] sm:$0xff]  ;;  %v262_v57 = vld [vmem:[#allocation7 + $0x570] sm:$0xff] }
  0xcc   :  { %1007 = vmatpush.msrb.mxu2 %v322_v58  ;;  %1029 = vmatpush.msrb.mxu3 %v407_v59  ;;  %v540_v3 = vpop.f32.mrf.mxu1  ;;  %v347_v58 = vld [vmem:[#allocation7 + $0x818] sm:$0xff]  ;;  %v472_v59 = vld [vmem:[#allocation7 + $0xc00] sm:$0xff] }
  0xcd   :  { %795 = vmatmul.f32.gmra.mxu0 %v1379_v35  ;;  %864 = vmatmul.f32.gmra.mxu3 %v1363_v45  ;;  %v541_v8 = vadd.f32 %v540_v3, %v518_v60  ;;  %v392_v45 = vld [vmem:[#allocation7 + $0x980] sm:$0xff]  ;;  %v257_v60 = vld [vmem:[#allocation7 + $0x548] sm:$0xff] }
  0xce   :  { %967 = vmatpush.msrb.mxu0 %v132_v62  ;;  %990 = vmatpush.msrb.mxu1 %v212_v63  ;;  %v586_v14 = vpop.f32.mrf.mxu3  ;;  %v342_v62 = vld [vmem:[#allocation7 + $0x7f0] sm:$0xff]  ;;  %v467_v63 = vld [vmem:[#allocation7 + $0xbd8] sm:$0xff] }
  0xcf   :  { %1008 = vmatpush.msrb.mxu2 %v317_v0  ;;  %1030 = vmatpush.msrb.mxu3 %v402_v1  ;;  %v564_v13 = vadd.f32 %v563_v5, %v541_v8  ;;  %v337_v1 = vld [vmem:[#allocation7 + $0x7c8] sm:$0xff]  ;;  %v491_v5 = vperm.slane %v1406_v46, 1 }
  0xd0   :  { %818 = vmatmul.f32.gmra.mxu1 %v1381_v41  ;;  %968 = vmatpush.msrb.mxu0 %v127_v2  ;;  %v462_v2 = vld [vmem:[#allocation7 + $0xbb0] sm:$0xff]  ;;  %v457_v8 = vld [vmem:[#allocation7 + $0xb88] sm:$0xff] }
  0xd1   :  { %991 = vmatpush.msrb.mxu1 %v207_v6  ;;  %1009 = vmatpush.msrb.mxu2 %v312_v7  ;;  %v587_v17 = vadd.f32 %v586_v14, %v564_v13  ;;  %v332_v7 = vld [vmem:[#allocation7 + $0x7a0] sm:$0xff]  ;;  %v1147_v13 = vld [vmem:[#allocation2] sm:$0xff] }
  0xd2   :  { %1031 = vmatpush.msrb.mxu3 %v397_v9  ;;  %969 = vmatpush.msrb.mxu0 %v122_v10  ;;  %v452_v10 = vld [vmem:[#allocation7 + $0xb60] sm:$0xff] }
  0xd3   :  { %992 = vmatpush.msrb.mxu1 %v202_v11  ;;  %1010 = vmatpush.msrb.mxu2 %v307_v12  ;;  %v609_v22 = vpop.f32.mrf.mxu0 }
  0xd4   :  { %1032 = vmatpush.msrb.mxu3 %v392_v45  ;;  %930 = vmatmul.f32.vlgmr.msra.gmra.mxu2 %v1417_v19  ;;  %v610_v24 = vadd.f32 %v609_v22, %v587_v17  ;;  %v447_v45 = vld [vmem:[#allocation7 + $0xb38] sm:$0xff]  ;;  %v432_v22 = vld [vmem:[#allocation7 + $0xac0] sm:$0xff] }
  0xd5   :  { %970 = vmatpush.msrb.mxu0 %v117_v15  ;;  %993 = vmatpush.msrb.mxu1 %v197_v16  ;;  %v442_v15 = vld [vmem:[#allocation7 + $0xb10] sm:$0xff] }
  0xd6   :  { %1011 = vmatpush.msrb.mxu2 %v302_v40  ;;  %1033 = vmatpush.msrb.mxu3 %v387_v18  ;;  %1075 = vst [vmem:[#allocation10] sm:$0xff] %v610_v24  ;;  %v437_v18 = vld [vmem:[#allocation7 + $0xae8] sm:$0xff] }
  0xd7   :  { %884 = vmatmul.f32.vlgmr.msra.gmra.mxu0 %v1420_v26  ;;  %953 = vmatmul.f32.vlgmr.msra.gmra.mxu3 %v1373_v4  ;;  %v372_v4 = vld [vmem:[#allocation7 + $0x8e0] sm:$0xff] }
  0xd8   :  { %971 = vmatpush.msrb.mxu0 %v112_v20  ;;  %994 = vmatpush.msrb.mxu1 %v192_v21  ;;  %v1148_v21 = vld [vmem:[#allocation5 + $0x10] sm:$0xff] }
  0xd9   :  { %1012 = vmatpush.msrb.mxu2 %v297_v48  ;;  %1034 = vmatpush.msrb.mxu3 %v382_v23  ;;  %v427_v23 = vld [vmem:[#allocation7 + $0xa98] sm:$0xff] }
  0xda   :  { %907 = vmatmul.f32.vlgmr.msra.gmra.mxu1 %v1424_v33  ;;  %972 = vmatpush.msrb.mxu0 %v107_v28  ;;  %v1150_v28 = vld [vmem:[#allocation5 + $0x18] sm:$0xff] }
  0xdb   :  { %995 = vmatpush.msrb.mxu1 %v187_v29  ;;  %1013 = vmatpush.msrb.mxu2 %v292_v30  ;;  %v422_v29 = vld [vmem:[#allocation7 + $0xa70] sm:$0xff]  ;;  %v1151_v30 = vld [vmem:[#allocation5 + $0x8] sm:$0xff] }
  0xdc   :  { %1035 = vmatpush.msrb.mxu3 %v377_v31  ;;  %973 = vmatpush.msrb.mxu0 %v102_v32  ;;  %v417_v32 = vld [vmem:[#allocation7 + $0xa48] sm:$0xff] }
  0xdd   :  { %996 = vmatpush.msrb.mxu1 %v182_v34  ;;  %1014 = vmatpush.msrb.mxu2 %v287_v36  ;;  %v412_v34 = vld [vmem:[#allocation7 + $0xa20] sm:$0xff]  ;;  %v1152_v36 = vld [vmem:[#allocation2 + $0x20] sm:$0xff] }
  0xde   :  { %1036 = vmatpush.msrb.mxu3 %v372_v4  ;;  %933 = vmatmul.f32.gmra.mxu2 %v1381_v41  ;;  %v543_v50 = vpop.f32.mrf.mxu1  ;;  %v521_v41 = vadd.f32 %v1412_v53, %v490_v55  ;;  %v1153_v4 = vld [vmem:[#allocation5 + $0x20] sm:$0xff] }
  0xdf   :  { %974 = vmatpush.msrb.mxu0 %v97_v37  ;;  %997 = vmatpush.msrb.mxu1 %v177_v38 }
  0xe0   :  { %1015 = vmatpush.msrb.mxu2 %v282_v39  ;;  %1037 = vmatpush.msrb.mxu3 %v367_v42  ;;  %v544_v55 = vadd.f32 %v543_v50, %v521_v41 }
  0xe1   :  { %887 = vmatmul.f32.gmra.mxu0 %v1376_v27  ;;  %956 = vmatmul.f32.gmra.mxu3 %v1387_v61  ;;  %v352_v27 = vld [vmem:[#allocation7 + $0x840] sm:$0xff]  ;;  %v477_v61 = vld [vmem:[#allocation7 + $0xc28] sm:$0xff] }
  0xe2   :  { %975 = vmatpush.msrb.mxu0 %v92_v43  ;;  %998 = vmatpush.msrb.mxu1 %v172_v44 }
  0xe3   :  { %1016 = vmatpush.msrb.mxu2 %v277_v47  ;;  %1038 = vmatpush.msrb.mxu3 %v362_v49 }
  0xe4   :  { %1052 = vmatpush.msra.mxu0 %v487_v51  ;;  %1120 = vmatpush.msra.mxu1 %v487_v51 }
  0xe5   :  { %910 = vmatmul.f32.gmra.mxu1 %v1379_v35  ;;  %1017 = vmatpush.msrb.mxu2 %v272_v52  ;;  %v252_v35 = vld [vmem:[#allocation7 + $0x520] sm:$0xff]  ;;  %v492_v52 = vperm.slane %v1406_v46, 2 }
  0xe6   :  { %1039 = vmatpush.msrb.mxu3 %v357_v54  ;;  %1053 = vmatpush.msra.mxu0 %v482_v25 }
  0xe7   :  { %1121 = vmatpush.msra.mxu1 %v482_v25  ;;  %1018 = vmatpush.msrb.mxu2 %v267_v56 }
  0xe8   :  { %1040 = vmatpush.msrb.mxu3 %v352_v27  ;;  %1054 = vmatpush.msra.mxu0 %v477_v61  ;;  %v632_v53 = vpop.f32.mrf.mxu1  ;;  %v566_v0 = vpop.f32.mrf.mxu2 }
  0xe9   :  { %1122 = vmatpush.msra.mxu1 %v477_v61  ;;  %1019 = vmatpush.msrb.mxu2 %v262_v57  ;;  %v567_v3 = vadd.f32 %v566_v0, %v544_v55  ;;  %v633_v11 = vadd.f32 %v632_v53, %v491_v5 }
  0xea   :  { %1041 = vmatpush.msrb.mxu3 %v347_v58  ;;  %1055 = vmatpush.msra.mxu0 %v472_v59 }
  0xeb   :  { %1123 = vmatpush.msra.mxu1 %v472_v59  ;;  %1020 = vmatpush.msrb.mxu2 %v257_v60  ;;  %v589_v6 = vpop.f32.mrf.mxu3 }
  0xec   :  { %1042 = vmatpush.msrb.mxu3 %v342_v62  ;;  %1056 = vmatpush.msra.mxu0 %v467_v63  ;;  %v590_v9 = vadd.f32 %v589_v6, %v567_v3 }
  0xed   :  { %1124 = vmatpush.msra.mxu1 %v467_v63  ;;  %1021 = vmatpush.msrb.mxu2 %v252_v35 }
  0xee   :  { %1043 = vmatpush.msrb.mxu3 %v337_v1  ;;  %1057 = vmatpush.msra.mxu0 %v462_v2  ;;  %v493_v1 = vperm.slane %v1406_v46, 3 }
  0xef   :  { %1125 = vmatpush.msra.mxu1 %v462_v2  ;;  %1022 = vmatmul.f32.vlgmr.msrb.gmra.mxu2 %v1424_v33 }
  0xf0   :  { %1044 = vmatpush.msrb.mxu3 %v332_v7  ;;  %1058 = vmatpush.msra.mxu0 %v457_v8  ;;  %v612_v12 = vpop.f32.mrf.mxu0 }
  0xf1   :  { %1126 = vmatpush.msra.mxu1 %v457_v8  ;;  %976 = vmatmul.f32.vlgmr.msrb.gmra.mxu0 %v1147_v13  ;;  %v613_v14 = vadd.f32 %v612_v12, %v590_v9 }
  0xf2   :  { %1045 = vmatmul.f32.vlgmr.msrb.gmra.mxu3 %v1417_v19  ;;  %1059 = vmatpush.msra.mxu0 %v452_v10  ;;  %v1149_v19 = vld [vmem:[#allocation5] sm:$0xff] }
  0xf3   :  { %1127 = vmatpush.msra.mxu1 %v452_v10  ;;  %1080 = vst [vmem:[#allocation11] sm:$0xff] %v613_v14  ;;  %v635_v16 = vpop.f32.mrf.mxu1  ;;  %v655_v17 = vpop.f32.mrf.mxu2 }
  0xf4   :  { %999 = vmatmul.f32.vlgmr.msrb.gmra.mxu1 %v1420_v26  ;;  %1060 = vmatpush.msra.mxu0 %v447_v45  ;;  %v656_v40 = vadd.f32 %v655_v17, %v633_v11  ;;  %v636_v37 = vadd.f32 %v635_v16, %v491_v5 }
  0xf5   :  { %1128 = vmatpush.msra.mxu1 %v447_v45 }
  0xf6   :  { %1061 = vmatpush.msra.mxu0 %v442_v15  ;;  %v678_v20 = vpop.f32.mrf.mxu3 }
  0xf7   :  { %1129 = vmatpush.msra.mxu1 %v442_v15  ;;  %1025 = vmatmul.f32.gmra.mxu2 %v1148_v21  ;;  %v679_v48 = vadd.f32 %v678_v20, %v656_v40 }
  0xf8   :  { %1062 = vmatpush.msra.mxu0 %v437_v18 }
  0xf9   :  { %1130 = vmatpush.msra.mxu1 %v437_v18  ;;  %979 = vmatmul.f32.gmra.mxu0 %v1149_v19  ;;  %v701_v24 = vpop.f32.mrf.mxu0 }
  0xfa   :  { %1048 = vmatmul.f32.gmra.mxu3 %v1150_v28  ;;  %1063 = vmatpush.msra.mxu0 %v432_v22  ;;  %v702_v26 = vadd.f32 %v701_v24, %v679_v48  ;;  %v494_v24 = vperm.slane %v1406_v46, 4 }
  0xfb   :  { %1131 = vmatpush.msra.mxu1 %v432_v22 }
  0xfc   :  { %1002 = vmatmul.f32.gmra.mxu1 %v1151_v30  ;;  %1064 = vmatpush.msra.mxu0 %v427_v23  ;;  %v724_v31 = vpop.f32.mrf.mxu1 }
  0xfd   :  { %1132 = vmatpush.msra.mxu1 %v427_v23  ;;  %v725_v33 = vadd.f32 %v724_v31, %v702_v26 }
  0xfe   :  { %1065 = vmatpush.msra.mxu0 %v422_v29 }
  0xff   :  { %1133 = vmatpush.msra.mxu1 %v422_v29  ;;  %1076 = vst [vmem:[#allocation10 + $0x8] sm:$0xff] %v725_v33 }
 0x100   :  { %1066 = vmatpush.msra.mxu0 %v417_v32 }
 0x101   :  { %1134 = vmatpush.msra.mxu1 %v417_v32 }
 0x102   :  { %1067 = vmatpush.msra.mxu0 %v412_v34 }
 0x103   :  { %1135 = vmatpush.msra.mxu1 %v412_v34  ;;  %1068 = vmatmul.f32.vlgmr.msra.gmra.mxu0 %v1152_v36 }
 0x104   :  { %1071 = vmatmul.f32.vlgmr.msra.gmra.mxu1 %v1153_v4 }
 0x10e   :  { %v658_v38 = vpop.f32.mrf.mxu2 }
 0x10f   :  { %v659_v39 = vadd.f32 %v658_v38, %v636_v37 }
 0x111   :  { %v681_v42 = vpop.f32.mrf.mxu3 }
 0x112   :  { %v682_v43 = vadd.f32 %v681_v42, %v659_v39 }
 0x113   :  { %v704_v44 = vpop.f32.mrf.mxu0 }
 0x114   :  { %v705_v47 = vadd.f32 %v704_v44, %v682_v43 }
 0x116   :  { %v727_v49 = vpop.f32.mrf.mxu1 }
 0x117   :  { %v728_v50 = vadd.f32 %v727_v49, %v705_v47 }
 0x119   :  { %1081 = vst [vmem:[#allocation11 + $0x8] sm:$0xff] %v728_v50 }
 0x122   :  { %v747_v51 = vpop.f32.mrf.mxu2 }
 0x123   :  { %v748_v41 = vadd.f32 %v747_v51, %v492_v52 }
 0x12b   :  { %v750_v54 = vpop.f32.mrf.mxu2  ;;  %v770_v25 = vpop.f32.mrf.mxu3 }
 0x12c   :  { %v771_v56 = vadd.f32 %v770_v25, %v748_v41  ;;  %v751_v62 = vadd.f32 %v750_v54, %v492_v52 }
 0x130   :  { %v793_v27 = vpop.f32.mrf.mxu0 }
 0x131   :  { %v794_v61 = vadd.f32 %v793_v27, %v771_v56 }
 0x133   :  { %v816_v57 = vpop.f32.mrf.mxu1 }
 0x134   :  { %v817_v58 = vadd.f32 %v816_v57, %v794_v61  ;;  %v839_v59 = vpop.f32.mrf.mxu2 }
 0x136   :  { %v840_v55 = vadd.f32 %v839_v59, %v817_v58 }
 0x138   :  { %1077 = vst [vmem:[#allocation10 + $0x10] sm:$0xff] %v840_v55 }
 0x13d   :  { %v773_v60 = vpop.f32.mrf.mxu3 }
 0x13e   :  { %v774_v53 = vadd.f32 %v773_v60, %v751_v62 }
 0x146   :  { %v862_v63 = vpop.f32.mrf.mxu3 }
 0x147   :  { %v863_v8 = vadd.f32 %v862_v63, %v493_v1 }
 0x14a   :  { %v796_v35 = vpop.f32.mrf.mxu0 }
 0x14b   :  { %v797_v0 = vadd.f32 %v796_v35, %v774_v53 }
 0x14d   :  { %v819_v2 = vpop.f32.mrf.mxu1  ;;  %v842_v3 = vpop.f32.mrf.mxu2 }
 0x14e   :  { %v820_v5 = vadd.f32 %v819_v2, %v797_v0 }
 0x150   :  { %v843_v6 = vadd.f32 %v842_v3, %v820_v5  ;;  %v865_v7 = vpop.f32.mrf.mxu3 }
 0x151   :  { %v866_v15 = vadd.f32 %v865_v7, %v493_v1 }
 0x152   :  { %1082 = vst [vmem:[#allocation11 + $0x10] sm:$0xff] %v843_v6 }
 0x154   :  { %v885_v9 = vpop.f32.mrf.mxu0 }
 0x155   :  { %v886_v10 = vadd.f32 %v885_v9, %v863_v8 }
 0x157   :  { %v908_v11 = vpop.f32.mrf.mxu1  ;;  %v931_v12 = vpop.f32.mrf.mxu2 }
 0x158   :  { %v909_v13 = vadd.f32 %v908_v11, %v886_v10 }
 0x15a   :  { %v932_v45 = vadd.f32 %v931_v12, %v909_v13  ;;  %v954_v14 = vpop.f32.mrf.mxu3 }
 0x15c   :  { %v955_v16 = vadd.f32 %v954_v14, %v932_v45 }
 0x15e   :  { %1078 = vst [vmem:[#allocation10 + $0x18] sm:$0xff] %v955_v16  ;;  %v888_v17 = vpop.f32.mrf.mxu0 }
 0x15f   :  { %v889_v40 = vadd.f32 %v888_v17, %v866_v15 }
 0x161   :  { %v934_v20 = vpop.f32.mrf.mxu2 }
 0x162   :  { %v911_v18 = vpop.f32.mrf.mxu1 }
 0x163   :  { %v912_v21 = vadd.f32 %v911_v18, %v889_v40 }
 0x164   :  { %v957_v22 = vpop.f32.mrf.mxu3 }
 0x165   :  { %v935_v48 = vadd.f32 %v934_v20, %v912_v21 }
 0x167   :  { %v958_v19 = vadd.f32 %v957_v22, %v935_v48 }
 0x169   :  { %1083 = vst [vmem:[#allocation11 + $0x18] sm:$0xff] %v958_v19 }
 0x16e   :  { %v977_v23 = vpop.f32.mrf.mxu0 }
 0x16f   :  { %v978_v29 = vadd.f32 %v977_v23, %v494_v24 }
 0x171   :  { %v1000_v28 = vpop.f32.mrf.mxu1 }
 0x172   :  { %v1023_v26 = vpop.f32.mrf.mxu2  ;;  %v1001_v32 = vadd.f32 %v1000_v28, %v978_v29 }
 0x174   :  { %v1024_v37 = vadd.f32 %v1023_v26, %v1001_v32 }
 0x175   :  { %v1046_v30 = vpop.f32.mrf.mxu3 }
 0x176   :  { %v980_v31 = vpop.f32.mrf.mxu0  ;;  %v1047_v46 = vadd.f32 %v1046_v30, %v1024_v37 }
 0x177   :  { %v981_v33 = vadd.f32 %v980_v31, %v494_v24 }
 0x179   :  { %v1003_v34 = vpop.f32.mrf.mxu1 }
 0x17a   :  { %v1004_v36 = vadd.f32 %v1003_v34, %v981_v33  ;;  %v1026_v4 = vpop.f32.mrf.mxu2 }
 0x17c   :  { %v1027_v38 = vadd.f32 %v1026_v4, %v1004_v36 }
 0x17d   :  { %v1049_v39 = vpop.f32.mrf.mxu3 }
 0x17e   :  { %v1050_v42 = vadd.f32 %v1049_v39, %v1027_v38 }
 0x180   :  { %v1069_v43 = vpop.f32.mrf.mxu0 }
 0x181   :  { %v1070_v44 = vadd.f32 %v1069_v43, %v1047_v46  ;;  %v1072_v47 = vpop.f32.mrf.mxu1 }
 0x182   :  { %v1073_v49 = vadd.f32 %v1072_v47, %v1050_v42 }
 0x183   :  { %1079 = vst [vmem:[#allocation10 + $0x20] sm:$0xff] %v1070_v44 }
 0x184   :  { %1084 = vst [vmem:[#allocation11 + $0x20] sm:$0xff] %v1073_v49  ;;  %1095 = dma.vmem_to_hbm [thread:$0]  %s1091_s3, 640, %s1093_s15, [#allocation4]  }
 0x185   :  { %1106 = dma.vmem_to_hbm [thread:$0]  %s1102_s17, 640, %s1104_s20, [#allocation12]  }
 0x186   :  { %1304 = dma.done.wait [#allocation4], 640  }
 0x187   :  { %1305 = vsyncadd [#allocation4], 4294966656 }
 0x188   :  { %1306 = dma.done.wait [#allocation12], 640  }
 0x189   :  { %1307 = vsyncadd [#allocation12], 4294966656 }
 0x18a   :  { %1115 = vsyncpa [#allocation3], 1 }
 0x18b   :  { %1116 = vsyncpa [#allocation6], 1 }
 0x18c   :  { %1117 = vsyncpa [#allocation9], 1 }
 0x18d   :  { %1118 = vsyncpa [#allocation4], 1 }
 0x18e   :  { %1119 = vsyncpa [#allocation12], 1 }

</bundles_post_ra>
